<compile_context>
chip_gen: v6e
topology: v6e:2x2x1
jax: 0.10.0
libtpu: 0.0.40
codegen_flags: <defaults>
</compile_context>

<pallas_src>
import numpy as np
import jax
import jax.numpy as jnp
from jax.experimental import pallas as pl
from jax.experimental.pallas import tpu as pltpu

IN_DIM = 32           # in_dim
MEM_DIM = 32          # mem_dim
N_MAX = 8             # max children per node (padded slots read the zero rows)
LEVEL_TILE = 8        # nodes processed per loop step (one wavefront tile)


# --------------------------------- kernel ----------------------------------

def _tree_lstm_kernel(scatter_ref,                       # SMEM  (n_pad,) int32: write slot per node
                      feat_ref,                          # VMEM  (n_pad, IN_DIM)
                      w_xg_ref, w_hg_ref, b_ref,         # VMEM  fused weights (resident)
                      s_sum_ref, s_bcast_ref,            # VMEM  constant 0/1 sum / broadcast mats
                      out_ref,                           # VMEM  (n_pad, 2*mem)  packed [c | h]
                      gx_ref, stage_ref):                # VMEM  scratch
    m = MEM_DIM
    tile = LEVEL_TILE
    tn = tile * N_MAX
    n_pad = out_ref.shape[0]
    n_tiles = n_pad // tile

    # ---------------- prologue (grid == (1,), runs once) --------------------
    # Child staging must start at exact zeros: unwritten slots back leaf /
    # padded / dummy children.
    stage_ref[...] = jnp.zeros_like(stage_ref)
    # Hoisted x-path: one batched matmul for every node, off the serial chain.
    gx_ref[...] = (jnp.dot(feat_ref[...], w_xg_ref[...],
                           preferred_element_type=jnp.float32) + b_ref[...])

    w_hg = w_hg_ref[...]            # (mem, 4*mem)   resident in vregs
    s_sum = s_sum_ref[...]          # (tile, tn)     per-node child-sum matrix
    s_bcast = s_bcast_ref[...]      # (tn, tile)     node -> child-slot broadcast

    # ---------------- wavefront loop: one tile of a level per step ----------
    @pl.loop(0, n_tiles, unroll=(n_tiles <= 8))
    def _(t):
        node_base = pl.multiple_of(t * tile, tile)
        stage_base = pl.multiple_of(t * tn, tn)

        # One contiguous gather of this tile's children (scatter-on-write).
        child = stage_ref[pl.ds(stage_base, tn), :]      # (tn, 2m)  [c | h]
        child_c = child[:, :m]
        child_h = child[:, m:]
        gx = gx_ref[pl.ds(node_base, tile), :]           # (tile, 4m)

        # h-path matmul for the whole tile: (tn, m) x (m, 4m).
        ch = jnp.dot(child_h, w_hg, preferred_element_type=jnp.float32)          # (tn, 4m)

        # f_j = sigmoid(fh(h_j) + fx(x_parent));  broadcast fx row to child slots
        # with a constant 0/1 matmul (MXU, padded child rows give fc == 0).
        gxf_b = jnp.dot(s_bcast, gx[:, 3 * m:], preferred_element_type=jnp.float32)  # (tn, m)
        f = jax.nn.sigmoid(ch[:, 3 * m:] + gxf_b)
        fc = f * child_c                                                           # (tn, m)

        # Per-node sums over the N_MAX child slots (constant 0/1 matmuls).
        ch_sum = jnp.dot(s_sum, ch, preferred_element_type=jnp.float32)            # (tile, 4m)
        fc_sum = jnp.dot(s_sum, fc, preferred_element_type=jnp.float32)            # (tile, m)

        # iou = ioux(x) + iouh(sum_j h_j)   (all biases already fused into gx).
        iou = gx[:, :3 * m] + ch_sum[:, :3 * m]
        i = jax.nn.sigmoid(iou[:, 0 * m:1 * m])
        o = jax.nn.sigmoid(iou[:, 1 * m:2 * m])
        u = jnp.tanh(iou[:, 2 * m:3 * m])

        c = i * u + fc_sum                               # (tile, m)
        h = o * jnp.tanh(c)
        packed = jnp.concatenate([c, h], axis=1)         # (tile, 2m)

        # Contiguous result store for the whole tile.
        out_ref[pl.ds(node_base, tile), :] = packed

        # Scatter-on-write: hand each node's packed state to its parent's
        # child slot (root / dummy nodes go to a trash row that is never read).
        for j in range(tile):
            p = scatter_ref[node_base + j]
            stage_ref[pl.ds(p, 1), :] = packed[j:j + 1, :]


@jax.jit
def _tree_lstm_call(scatter_tbl, feats_padded, w_xg, w_hg, b_fused, s_sum, s_bcast):
    n_pad = feats_padded.shape[0]
    m = MEM_DIM
    tn = LEVEL_TILE * N_MAX
    stage_rows = n_pad * N_MAX + 8                      # + trash region (multiple of 8)

    grid_spec = pltpu.PrefetchScalarGridSpec(
        num_scalar_prefetch=1,                          # scatter table -> SMEM
        grid=(1,),                                      # single step; tree walked in-kernel
        in_specs=[
            pl.BlockSpec((n_pad, IN_DIM), lambda i, tbl: (0, 0)),         # features (resident)
            pl.BlockSpec((IN_DIM, 4 * m), lambda i, tbl: (0, 0)),         # [W_ioux | W_fx]
            pl.BlockSpec((m, 4 * m), lambda i, tbl: (0, 0)),              # [W_iouh | W_fh]
            pl.BlockSpec((1, 4 * m), lambda i, tbl: (0, 0)),              # fused bias
            pl.BlockSpec((LEVEL_TILE, tn), lambda i, tbl: (0, 0)),        # child-sum matrix
            pl.BlockSpec((tn, LEVEL_TILE), lambda i, tbl: (0, 0)),        # broadcast matrix
        ],
        out_specs=pl.BlockSpec((n_pad, 2 * m), lambda i, tbl: (0, 0)),    # packed [c | h]
        scratch_shapes=[
            pltpu.VMEM((n_pad, 4 * m), jnp.float32),                      # gx_all
            pltpu.VMEM((stage_rows, 2 * m), jnp.float32),                 # child staging
        ],
    )
    return pl.pallas_call(
        _tree_lstm_kernel,
        grid_spec=grid_spec,
        out_shape=jax.ShapeDtypeStruct((n_pad, 2 * m), jnp.float32),
        compiler_params=pltpu.CompilerParams(
            dimension_semantics=("arbitrary",)),        # inherently sequential wavefronts
    )(scatter_tbl, feats_padded, w_xg, w_hg, b_fused, s_sum, s_bcast)


# ----------------------------- host-side glue ------------------------------

class Tree:
    def __init__(self, idx, children=()):
        self.idx = idx
        self.children = list(children)
        self.num_children = len(self.children)
        self.state = None
        self.ref_state = None


def init_params(key, in_dim, mem_dim):
    """nn.Linear-shaped parameters, stored transposed (fan_in, fan_out)."""
    ks = jax.random.split(key, 8)

    def lin(kw, kb, fan_in, fan_out):
        bound = 1.0 / jnp.sqrt(fan_in)
        w = jax.random.uniform(kw, (fan_in, fan_out), jnp.float32, -bound, bound)
        b = jax.random.uniform(kb, (1, fan_out), jnp.float32, -bound, bound)
        return w, b

    w_ioux, b_ioux = lin(ks[0], ks[1], in_dim, 3 * mem_dim)
    w_iouh, b_iouh = lin(ks[2], ks[3], mem_dim, 3 * mem_dim)
    w_fx, b_fx = lin(ks[4], ks[5], in_dim, mem_dim)
    w_fh, b_fh = lin(ks[6], ks[7], mem_dim, mem_dim)
    return (w_ioux, b_ioux, w_iouh, b_iouh, w_fx, b_fx, w_fh, b_fh)


def fuse_params(params):
    """Fuse the four Linears into two 128-lane-wide matmuls + one bias."""
    w_ioux, b_ioux, w_iouh, b_iouh, w_fx, b_fx, w_fh, b_fh = params
    w_xg = jnp.concatenate([w_ioux, w_fx], axis=1)                        # (in_dim, 4*mem)
    w_hg = jnp.concatenate([w_iouh, w_fh], axis=1)                        # (mem, 4*mem)
    b_fused = jnp.concatenate([b_ioux + b_iouh, b_fx + b_fh], axis=1)     # (1, 4*mem)
    return w_xg, w_hg, b_fused


def build_schedule(tree):
    """Level (wavefront) ordering with per-level padding, plus the scatter table.

    Returns:
      order:   list of length n_pad; entry is a Tree node or None (dummy padding).
      pos:     dict id(node) -> position in `order`.
      scatter: int32[n_pad]; position pos writes its packed state to staging row
               scatter[pos] (= parent_pos*N_MAX + child_slot, or a trash row).
    """
    # TODO(synk): the data-dependent tree topology itself has no Pallas
    # equivalent; it is linearized host-side into a level schedule / scatter
    # table (pure Python bookkeeping, no tensor math); all numerics run in-kernel.
    nodes = []

    def visit(node):
        for ch in node.children:
            visit(ch)
        node._level = 0 if not node.children else 1 + max(c._level for c in node.children)
        nodes.append(node)

    visit(tree)
    max_level = max(n._level for n in nodes)
    levels = [[] for _ in range(max_level + 1)]
    for n in nodes:
        levels[n._level].append(n)

    order, pos = [], {}
    for lev in levels:
        for n in lev:
            pos[id(n)] = len(order)
            order.append(n)
        while len(order) % LEVEL_TILE != 0:          # pad each level -> tiles never
            order.append(None)                        # mix dependent levels

    n_pad = len(order)
    trash = n_pad * N_MAX                             # staging row never read
    scatter = np.full((n_pad,), trash, dtype=np.int32)
    for n in nodes:
        assert len(n.children) <= N_MAX, "node has more children than N_MAX"
        for slot, ch in enumerate(n.children):
            scatter[pos[id(ch)]] = pos[id(n)] * N_MAX + slot
    return order, pos, scatter


def _make_sum_mats():
    s = np.zeros((LEVEL_TILE, LEVEL_TILE * N_MAX), np.float32)
    for i in range(LEVEL_TILE):
        s[i, i * N_MAX:(i + 1) * N_MAX] = 1.0
    return jnp.asarray(s), jnp.asarray(np.ascontiguousarray(s.T))


def tree_lstm_forward(tree, features, fused_params):
    """Whole-tree ChildSumTreeLSTM forward in a single pallas_call."""
    order, pos, scatter = build_schedule(tree)
    idx = np.array([n.idx if n is not None else 0 for n in order], dtype=np.int32)
    mask = np.array([1.0 if n is not None else 0.0 for n in order],
                    dtype=np.float32)[:, None]
    feats_padded = features[jnp.asarray(idx)] * jnp.asarray(mask)   # one gather + mask
    s_sum, s_bcast = _make_sum_mats()

    # TODO(synk): forest batching across the second TensorCore (v7x) is not
    # implemented here — the demo processes a single tree per call.
    state = _tree_lstm_call(jnp.asarray(scatter), feats_padded,
                            *fused_params, s_sum, s_bcast)

    m = MEM_DIM
    for n in order:
        if n is None:
            continue
        p = pos[id(n)]
        n.state = (state[p:p + 1, :m], state[p:p + 1, m:])
    return tree.state


# ------------------------- pure-JAX reference check ------------------------

def _ref_node_forward(x, child_c, child_h, params):
    w_ioux, b_ioux, w_iouh, b_iouh, w_fx, b_fx, w_fh, b_fh = params
    hp = jax.lax.Precision.HIGHEST
    child_h_sum = jnp.sum(child_h, axis=0, keepdims=True)
    iou = (jnp.dot(x, w_ioux, precision=hp) + b_ioux
           + jnp.dot(child_h_sum, w_iouh, precision=hp) + b_iouh)
    i, o, u = jnp.split(iou, 3, axis=1)
    i, o, u = jax.nn.sigmoid(i), jax.nn.sigmoid(o), jnp.tanh(u)
    f = jax.nn.sigmoid(jnp.dot(child_h, w_fh, precision=hp) + b_fh
                       + jnp.dot(x, w_fx, precision=hp) + b_fx)
    fc = f * child_c
    c = i * u + jnp.sum(fc, axis=0, keepdims=True)
    h = o * jnp.tanh(c)
    return c, h


def _ref_forward(tree, features, params):
    for ch in tree.children:
        _ref_forward(ch, features, params)
    if tree.num_children == 0:
        child_c = jnp.zeros((1, MEM_DIM), jnp.float32)
        child_h = jnp.zeros((1, MEM_DIM), jnp.float32)
    else:
        cs, hs = zip(*(ch.ref_state for ch in tree.children))
        child_c = jnp.concatenate(cs, axis=0)
        child_h = jnp.concatenate(hs, axis=0)
    tree.ref_state = _ref_node_forward(features[tree.idx][None, :], child_c, child_h, params)
    return tree.ref_state


# ---------------------------------- main ------------------------------------

if __name__ == "__main__":
    key = jax.random.PRNGKey(0)
    k_feat, k_par = jax.random.split(key)

    # Small deterministic tree:   0
    #                            / \
    #                           1   2
    #                          / \
    #                         3   4
    tree = Tree(0, [Tree(1, [Tree(3), Tree(4)]), Tree(2)])
    num_nodes = 5

    features = jax.random.normal(k_feat, (num_nodes, IN_DIM), jnp.float32)
    raw_params = init_params(k_par, IN_DIM, MEM_DIM)
    fused_params = fuse_params(raw_params)

    root_c, root_h = tree_lstm_forward(tree, features, fused_params)
    jax.block_until_ready((root_c, root_h))

    assert root_c.shape == (1, MEM_DIM) and root_h.shape == (1, MEM_DIM)
    assert bool(jnp.all(jnp.isfinite(root_c))) and bool(jnp.all(jnp.isfinite(root_h)))

    # Verify every node's state against a pure-JAX recursive reference.
    _ref_forward(tree, features, raw_params)
    order, _, _ = build_schedule(tree)
    for node in order:
        if node is None:
            continue
        kc, kh = node.state
        rc, rh = node.ref_state
        np.testing.assert_allclose(np.asarray(kc), np.asarray(rc), rtol=5e-3, atol=5e-3)
        np.testing.assert_allclose(np.asarray(kh), np.asarray(rh), rtol=5e-3, atol=5e-3)

    print("KERNEL_OK")
</pallas_src>

<mosaic_0001>
module attributes {stable_mosaic.version = 11 : i64} {
  func.func @_tree_lstm_kernel(%arg0: i32, %arg1: memref<24xi32, #tpu.memory_space<smem>>, %arg2: memref<24x32xf32, #tpu.memory_space<vmem>>, %arg3: memref<32x128xf32, #tpu.memory_space<vmem>>, %arg4: memref<32x128xf32, #tpu.memory_space<vmem>>, %arg5: memref<1x128xf32, #tpu.memory_space<vmem>>, %arg6: memref<8x64xf32, #tpu.memory_space<vmem>>, %arg7: memref<64x8xf32, #tpu.memory_space<vmem>>, %arg8: memref<24x64xf32, #tpu.memory_space<vmem>>, %arg9: memref<24x128xf32, #tpu.memory_space<vmem>>, %arg10: memref<200x64xf32, #tpu.memory_space<vmem>>) attributes {dimension_semantics = [#tpu.dimension_semantics<arbitrary>], iteration_bounds = array<i64: 1>, scalar_prefetch = 1 : i64, scratch_operands = 2 : i64, tpu.core_type = #tpu.core_type<tc>, window_params = [{pipeline_mode = #tpu.pipeline_mode<synchronous>, transform_indices = @transform_0, window_bounds = array<i64: 24, 32>}, {pipeline_mode = #tpu.pipeline_mode<synchronous>, transform_indices = @transform_1, window_bounds = array<i64: 32, 128>}, {pipeline_mode = #tpu.pipeline_mode<synchronous>, transform_indices = @transform_2, window_bounds = array<i64: 32, 128>}, {pipeline_mode = #tpu.pipeline_mode<synchronous>, transform_indices = @transform_3, window_bounds = array<i64: 1, 128>}, {pipeline_mode = #tpu.pipeline_mode<synchronous>, transform_indices = @transform_4, window_bounds = array<i64: 8, 64>}, {pipeline_mode = #tpu.pipeline_mode<synchronous>, transform_indices = @transform_5, window_bounds = array<i64: 64, 8>}, {pipeline_mode = #tpu.pipeline_mode<synchronous>, transform_indices = @transform_6, window_bounds = array<i64: 24, 64>}]} {
    %cst = arith.constant 0.000000e+00 : f32
    %0 = vector.broadcast %cst : f32 to vector<200x64xf32>
    %c0 = arith.constant 0 : index
    %c0_0 = arith.constant 0 : index
    %1 = vector.load %arg10[%c0, %c0_0] : memref<200x64xf32, #tpu.memory_space<vmem>>, vector<200x64xf32>
    tpu.vector_store %arg10[%c0, %c0_0], %0 {strides = array<i32>} : memref<200x64xf32, #tpu.memory_space<vmem>>, vector<200x64xf32>,
    %c0_1 = arith.constant 0 : index
    %c0_2 = arith.constant 0 : index
    %2 = vector.load %arg2[%c0_1, %c0_2] : memref<24x32xf32, #tpu.memory_space<vmem>>, vector<24x32xf32>
    %c0_3 = arith.constant 0 : index
    %c0_4 = arith.constant 0 : index
    %3 = vector.load %arg3[%c0_3, %c0_4] : memref<32x128xf32, #tpu.memory_space<vmem>>, vector<32x128xf32>
    %cst_5 = arith.constant dense<0.000000e+00> : vector<24x128xf32>
    %4 = tpu.matmul %2, %3, %cst_5 {dimension_numbers = #tpu.dot_dimension_numbers<[1], [0], [0], [1], [0, 0, 1, 1], [], []>} : vector<24x32xf32>, vector<32x128xf32>, vector<24x128xf32> -> vector<24x128xf32>
    %c0_6 = arith.constant 0 : index
    %c0_7 = arith.constant 0 : index
    %5 = vector.load %arg5[%c0_6, %c0_7] : memref<1x128xf32, #tpu.memory_space<vmem>>, vector<1x128xf32>
    %6 = vector.broadcast %5 : vector<1x128xf32> to vector<24x128xf32>
    %7 = arith.addf %4, %6 : vector<24x128xf32>
    %c0_8 = arith.constant 0 : index
    %c0_9 = arith.constant 0 : index
    %8 = vector.load %arg9[%c0_8, %c0_9] : memref<24x128xf32, #tpu.memory_space<vmem>>, vector<24x128xf32>
    tpu.vector_store %arg9[%c0_8, %c0_9], %7 {strides = array<i32>} : memref<24x128xf32, #tpu.memory_space<vmem>>, vector<24x128xf32>,
    %c0_10 = arith.constant 0 : index
    %c0_11 = arith.constant 0 : index
    %9 = vector.load %arg4[%c0_10, %c0_11] : memref<32x128xf32, #tpu.memory_space<vmem>>, vector<32x128xf32>
    %c0_12 = arith.constant 0 : index
    %c0_13 = arith.constant 0 : index
    %10 = vector.load %arg6[%c0_12, %c0_13] : memref<8x64xf32, #tpu.memory_space<vmem>>, vector<8x64xf32>
    %c0_14 = arith.constant 0 : index
    %c0_15 = arith.constant 0 : index
    %11 = vector.load %arg7[%c0_14, %c0_15] : memref<64x8xf32, #tpu.memory_space<vmem>>, vector<64x8xf32>
    %c0_i32 = arith.constant 0 : i32
    %c1_i32 = arith.constant 1 : i32
    %12 = arith.muli %c0_i32, %c1_i32 : i32
    %c0_i32_16 = arith.constant 0 : i32
    %13 = arith.addi %c0_i32_16, %12 : i32
    %c8_i32 = arith.constant 8 : i32
    %14 = arith.muli %13, %c8_i32 : i32
    %15 = tpu.assume_multiple %14, 8 : i32
    %c64_i32 = arith.constant 64 : i32
    %16 = arith.muli %13, %c64_i32 : i32
    %17 = tpu.assume_multiple %16, 64 : i32
    %18 = arith.index_cast %17 : i32 to index
    %c0_17 = arith.constant 0 : index
    %19 = vector.load %arg10[%18, %c0_17] : memref<200x64xf32, #tpu.memory_space<vmem>>, vector<64x64xf32>
    %20 = vector.extract_strided_slice %19 {offsets = [0, 0], sizes = [64, 32], strides = [1, 1]} : vector<64x64xf32> to vector<64x32xf32>
    %21 = vector.extract_strided_slice %19 {offsets = [0, 32], sizes = [64, 32], strides = [1, 1]} : vector<64x64xf32> to vector<64x32xf32>
    %22 = arith.index_cast %15 : i32 to index
    %c0_18 = arith.constant 0 : index
    %23 = vector.load %arg9[%22, %c0_18] : memref<24x128xf32, #tpu.memory_space<vmem>>, vector<8x128xf32>
    %cst_19 = arith.constant dense<0.000000e+00> : vector<64x128xf32>
    %24 = tpu.matmul %21, %9, %cst_19 {dimension_numbers = #tpu.dot_dimension_numbers<[1], [0], [0], [1], [0, 0, 1, 1], [], []>} : vector<64x32xf32>, vector<32x128xf32>, vector<64x128xf32> -> vector<64x128xf32>
    %25 = vector.extract_strided_slice %23 {offsets = [0, 96], sizes = [8, 32], strides = [1, 1]} : vector<8x128xf32> to vector<8x32xf32>
    %cst_20 = arith.constant dense<0.000000e+00> : vector<64x32xf32>
    %26 = tpu.matmul %11, %25, %cst_20 {dimension_numbers = #tpu.dot_dimension_numbers<[1], [0], [0], [1], [0, 0, 1, 1], [], []>} : vector<64x8xf32>, vector<8x32xf32>, vector<64x32xf32> -> vector<64x32xf32>
    %27 = vector.extract_strided_slice %24 {offsets = [0, 96], sizes = [64, 32], strides = [1, 1]} : vector<64x128xf32> to vector<64x32xf32>
    %28 = arith.addf %27, %26 : vector<64x32xf32>
    %29 = arith.negf %28 : vector<64x32xf32>
    %30 = math.exp %29 : vector<64x32xf32>
    %cst_21 = arith.constant 1.000000e+00 : f32
    %31 = vector.broadcast %cst_21 : f32 to vector<64x32xf32>
    %32 = arith.addf %31, %30 : vector<64x32xf32>
    %33 = arith.divf %31, %32 : vector<64x32xf32>
    %34 = arith.mulf %33, %20 : vector<64x32xf32>
    %cst_22 = arith.constant dense<0.000000e+00> : vector<8x128xf32>
    %35 = tpu.matmul %10, %24, %cst_22 {dimension_numbers = #tpu.dot_dimension_numbers<[1], [0], [0], [1], [0, 0, 1, 1], [], []>} : vector<8x64xf32>, vector<64x128xf32>, vector<8x128xf32> -> vector<8x128xf32>
    %cst_23 = arith.constant dense<0.000000e+00> : vector<8x32xf32>
    %36 = tpu.matmul %10, %34, %cst_23 {dimension_numbers = #tpu.dot_dimension_numbers<[1], [0], [0], [1], [0, 0, 1, 1], [], []>} : vector<8x64xf32>, vector<64x32xf32>, vector<8x32xf32> -> vector<8x32xf32>
    %37 = vector.extract_strided_slice %23 {offsets = [0, 0], sizes = [8, 96], strides = [1, 1]} : vector<8x128xf32> to vector<8x96xf32>
    %38 = vector.extract_strided_slice %35 {offsets = [0, 0], sizes = [8, 96], strides = [1, 1]} : vector<8x128xf32> to vector<8x96xf32>
    %39 = arith.addf %37, %38 : vector<8x96xf32>
    %40 = vector.extract_strided_slice %39 {offsets = [0, 0], sizes = [8, 32], strides = [1, 1]} : vector<8x96xf32> to vector<8x32xf32>
    %41 = arith.negf %40 : vector<8x32xf32>
    %42 = math.exp %41 : vector<8x32xf32>
    %cst_24 = arith.constant 1.000000e+00 : f32
    %43 = vector.broadcast %cst_24 : f32 to vector<8x32xf32>
    %44 = arith.addf %43, %42 : vector<8x32xf32>
    %45 = arith.divf %43, %44 : vector<8x32xf32>
    %46 = vector.extract_strided_slice %39 {offsets = [0, 32], sizes = [8, 32], strides = [1, 1]} : vector<8x96xf32> to vector<8x32xf32>
    %47 = arith.negf %46 : vector<8x32xf32>
    %48 = math.exp %47 : vector<8x32xf32>
    %cst_25 = arith.constant 1.000000e+00 : f32
    %49 = vector.broadcast %cst_25 : f32 to vector<8x32xf32>
    %50 = arith.addf %49, %48 : vector<8x32xf32>
    %51 = arith.divf %49, %50 : vector<8x32xf32>
    %52 = vector.extract_strided_slice %39 {offsets = [0, 64], sizes = [8, 32], strides = [1, 1]} : vector<8x96xf32> to vector<8x32xf32>
    %53 = math.tanh %52 : vector<8x32xf32>
    %54 = arith.mulf %45, %53 : vector<8x32xf32>
    %55 = arith.addf %54, %36 : vector<8x32xf32>
    %56 = math.tanh %55 : vector<8x32xf32>
    %57 = arith.mulf %51, %56 : vector<8x32xf32>
    %58 = tpu.concatenate %55, %57 in 1 : vector<8x32xf32>, vector<8x32xf32> -> vector<8x64xf32>
    %59 = arith.index_cast %15 : i32 to index
    %c0_26 = arith.constant 0 : index
    %60 = vector.load %arg8[%59, %c0_26] : memref<24x64xf32, #tpu.memory_space<vmem>>, vector<8x64xf32>
    tpu.vector_store %arg8[%59, %c0_26], %58 {strides = array<i32>} : memref<24x64xf32, #tpu.memory_space<vmem>>, vector<8x64xf32>,
    %c0_i32_27 = arith.constant 0 : i32
    %61 = arith.addi %15, %c0_i32_27 : i32
    %62 = arith.index_cast %61 : i32 to index
    %63 = memref.load %arg1[%62] : memref<24xi32, #tpu.memory_space<smem>>
    %64 = vector.extract_strided_slice %58 {offsets = [0, 0], sizes = [1, 64], strides = [1, 1]} : vector<8x64xf32> to vector<1x64xf32>
    %65 = arith.index_cast %63 : i32 to index
    %c0_28 = arith.constant 0 : index
    %66 = vector.load %arg10[%65, %c0_28] : memref<200x64xf32, #tpu.memory_space<vmem>>, vector<1x64xf32>
    tpu.vector_store %arg10[%65, %c0_28], %64 {strides = array<i32>} : memref<200x64xf32, #tpu.memory_space<vmem>>, vector<1x64xf32>,
    %c1_i32_29 = arith.constant 1 : i32
    %67 = arith.addi %15, %c1_i32_29 : i32
    %68 = arith.index_cast %67 : i32 to index
    %69 = memref.load %arg1[%68] : memref<24xi32, #tpu.memory_space<smem>>
    %70 = vector.extract_strided_slice %58 {offsets = [1, 0], sizes = [1, 64], strides = [1, 1]} : vector<8x64xf32> to vector<1x64xf32>
    %71 = arith.index_cast %69 : i32 to index
    %c0_30 = arith.constant 0 : index
    %72 = vector.load %arg10[%71, %c0_30] : memref<200x64xf32, #tpu.memory_space<vmem>>, vector<1x64xf32>
    tpu.vector_store %arg10[%71, %c0_30], %70 {strides = array<i32>} : memref<200x64xf32, #tpu.memory_space<vmem>>, vector<1x64xf32>,
    %c2_i32 = arith.constant 2 : i32
    %73 = arith.addi %15, %c2_i32 : i32
    %74 = arith.index_cast %73 : i32 to index
    %75 = memref.load %arg1[%74] : memref<24xi32, #tpu.memory_space<smem>>
    %76 = vector.extract_strided_slice %58 {offsets = [2, 0], sizes = [1, 64], strides = [1, 1]} : vector<8x64xf32> to vector<1x64xf32>
    %77 = arith.index_cast %75 : i32 to index
    %c0_31 = arith.constant 0 : index
    %78 = vector.load %arg10[%77, %c0_31] : memref<200x64xf32, #tpu.memory_space<vmem>>, vector<1x64xf32>
    tpu.vector_store %arg10[%77, %c0_31], %76 {strides = array<i32>} : memref<200x64xf32, #tpu.memory_space<vmem>>, vector<1x64xf32>,
    %c3_i32 = arith.constant 3 : i32
    %79 = arith.addi %15, %c3_i32 : i32
    %80 = arith.index_cast %79 : i32 to index
    %81 = memref.load %arg1[%80] : memref<24xi32, #tpu.memory_space<smem>>
    %82 = vector.extract_strided_slice %58 {offsets = [3, 0], sizes = [1, 64], strides = [1, 1]} : vector<8x64xf32> to vector<1x64xf32>
    %83 = arith.index_cast %81 : i32 to index
    %c0_32 = arith.constant 0 : index
    %84 = vector.load %arg10[%83, %c0_32] : memref<200x64xf32, #tpu.memory_space<vmem>>, vector<1x64xf32>
    tpu.vector_store %arg10[%83, %c0_32], %82 {strides = array<i32>} : memref<200x64xf32, #tpu.memory_space<vmem>>, vector<1x64xf32>,
    %c4_i32 = arith.constant 4 : i32
    %85 = arith.addi %15, %c4_i32 : i32
    %86 = arith.index_cast %85 : i32 to index
    %87 = memref.load %arg1[%86] : memref<24xi32, #tpu.memory_space<smem>>
    %88 = vector.extract_strided_slice %58 {offsets = [4, 0], sizes = [1, 64], strides = [1, 1]} : vector<8x64xf32> to vector<1x64xf32>
    %89 = arith.index_cast %87 : i32 to index
    %c0_33 = arith.constant 0 : index
    %90 = vector.load %arg10[%89, %c0_33] : memref<200x64xf32, #tpu.memory_space<vmem>>, vector<1x64xf32>
    tpu.vector_store %arg10[%89, %c0_33], %88 {strides = array<i32>} : memref<200x64xf32, #tpu.memory_space<vmem>>, vector<1x64xf32>,
    %c5_i32 = arith.constant 5 : i32
    %91 = arith.addi %15, %c5_i32 : i32
    %92 = arith.index_cast %91 : i32 to index
    %93 = memref.load %arg1[%92] : memref<24xi32, #tpu.memory_space<smem>>
    %94 = vector.extract_strided_slice %58 {offsets = [5, 0], sizes = [1, 64], strides = [1, 1]} : vector<8x64xf32> to vector<1x64xf32>
    %95 = arith.index_cast %93 : i32 to index
    %c0_34 = arith.constant 0 : index
    %96 = vector.load %arg10[%95, %c0_34] : memref<200x64xf32, #tpu.memory_space<vmem>>, vector<1x64xf32>
    tpu.vector_store %arg10[%95, %c0_34], %94 {strides = array<i32>} : memref<200x64xf32, #tpu.memory_space<vmem>>, vector<1x64xf32>,
    %c6_i32 = arith.constant 6 : i32
    %97 = arith.addi %15, %c6_i32 : i32
    %98 = arith.index_cast %97 : i32 to index
    %99 = memref.load %arg1[%98] : memref<24xi32, #tpu.memory_space<smem>>
    %100 = vector.extract_strided_slice %58 {offsets = [6, 0], sizes = [1, 64], strides = [1, 1]} : vector<8x64xf32> to vector<1x64xf32>
    %101 = arith.index_cast %99 : i32 to index
    %c0_35 = arith.constant 0 : index
    %102 = vector.load %arg10[%101, %c0_35] : memref<200x64xf32, #tpu.memory_space<vmem>>, vector<1x64xf32>
    tpu.vector_store %arg10[%101, %c0_35], %100 {strides = array<i32>} : memref<200x64xf32, #tpu.memory_space<vmem>>, vector<1x64xf32>,
    %c7_i32 = arith.constant 7 : i32
    %103 = arith.addi %15, %c7_i32 : i32
    %104 = arith.index_cast %103 : i32 to index
    %105 = memref.load %arg1[%104] : memref<24xi32, #tpu.memory_space<smem>>
    %106 = vector.extract_strided_slice %58 {offsets = [7, 0], sizes = [1, 64], strides = [1, 1]} : vector<8x64xf32> to vector<1x64xf32>
    %107 = arith.index_cast %105 : i32 to index
    %c0_36 = arith.constant 0 : index
    %108 = vector.load %arg10[%107, %c0_36] : memref<200x64xf32, #tpu.memory_space<vmem>>, vector<1x64xf32>
    tpu.vector_store %arg10[%107, %c0_36], %106 {strides = array<i32>} : memref<200x64xf32, #tpu.memory_space<vmem>>, vector<1x64xf32>,
    %c1_i32_37 = arith.constant 1 : i32
    %c1_i32_38 = arith.constant 1 : i32
    %109 = arith.muli %c1_i32_37, %c1_i32_38 : i32
    %c0_i32_39 = arith.constant 0 : i32
    %110 = arith.addi %c0_i32_39, %109 : i32
    %c8_i32_40 = arith.constant 8 : i32
    %111 = arith.muli %110, %c8_i32_40 : i32
    %112 = tpu.assume_multiple %111, 8 : i32
    %c64_i32_41 = arith.constant 64 : i32
    %113 = arith.muli %110, %c64_i32_41 : i32
    %114 = tpu.assume_multiple %113, 64 : i32
    %115 = arith.index_cast %114 : i32 to index
    %c0_42 = arith.constant 0 : index
    %116 = vector.load %arg10[%115, %c0_42] : memref<200x64xf32, #tpu.memory_space<vmem>>, vector<64x64xf32>
    %117 = vector.extract_strided_slice %116 {offsets = [0, 0], sizes = [64, 32], strides = [1, 1]} : vector<64x64xf32> to vector<64x32xf32>
    %118 = vector.extract_strided_slice %116 {offsets = [0, 32], sizes = [64, 32], strides = [1, 1]} : vector<64x64xf32> to vector<64x32xf32>
    %119 = arith.index_cast %112 : i32 to index
    %c0_43 = arith.constant 0 : index
    %120 = vector.load %arg9[%119, %c0_43] : memref<24x128xf32, #tpu.memory_space<vmem>>, vector<8x128xf32>
    %cst_44 = arith.constant dense<0.000000e+00> : vector<64x128xf32>
    %121 = tpu.matmul %118, %9, %cst_44 {dimension_numbers = #tpu.dot_dimension_numbers<[1], [0], [0], [1], [0, 0, 1, 1], [], []>} : vector<64x32xf32>, vector<32x128xf32>, vector<64x128xf32> -> vector<64x128xf32>
    %122 = vector.extract_strided_slice %120 {offsets = [0, 96], sizes = [8, 32], strides = [1, 1]} : vector<8x128xf32> to vector<8x32xf32>
    %cst_45 = arith.constant dense<0.000000e+00> : vector<64x32xf32>
    %123 = tpu.matmul %11, %122, %cst_45 {dimension_numbers = #tpu.dot_dimension_numbers<[1], [0], [0], [1], [0, 0, 1, 1], [], []>} : vector<64x8xf32>, vector<8x32xf32>, vector<64x32xf32> -> vector<64x32xf32>
    %124 = vector.extract_strided_slice %121 {offsets = [0, 96], sizes = [64, 32], strides = [1, 1]} : vector<64x128xf32> to vector<64x32xf32>
    %125 = arith.addf %124, %123 : vector<64x32xf32>
    %126 = arith.negf %125 : vector<64x32xf32>
    %127 = math.exp %126 : vector<64x32xf32>
    %cst_46 = arith.constant 1.000000e+00 : f32
    %128 = vector.broadcast %cst_46 : f32 to vector<64x32xf32>
    %129 = arith.addf %128, %127 : vector<64x32xf32>
    %130 = arith.divf %128, %129 : vector<64x32xf32>
    %131 = arith.mulf %130, %117 : vector<64x32xf32>
    %cst_47 = arith.constant dense<0.000000e+00> : vector<8x128xf32>
    %132 = tpu.matmul %10, %121, %cst_47 {dimension_numbers = #tpu.dot_dimension_numbers<[1], [0], [0], [1], [0, 0, 1, 1], [], []>} : vector<8x64xf32>, vector<64x128xf32>, vector<8x128xf32> -> vector<8x128xf32>
    %cst_48 = arith.constant dense<0.000000e+00> : vector<8x32xf32>
    %133 = tpu.matmul %10, %131, %cst_48 {dimension_numbers = #tpu.dot_dimension_numbers<[1], [0], [0], [1], [0, 0, 1, 1], [], []>} : vector<8x64xf32>, vector<64x32xf32>, vector<8x32xf32> -> vector<8x32xf32>
    %134 = vector.extract_strided_slice %120 {offsets = [0, 0], sizes = [8, 96], strides = [1, 1]} : vector<8x128xf32> to vector<8x96xf32>
    %135 = vector.extract_strided_slice %132 {offsets = [0, 0], sizes = [8, 96], strides = [1, 1]} : vector<8x128xf32> to vector<8x96xf32>
    %136 = arith.addf %134, %135 : vector<8x96xf32>
    %137 = vector.extract_strided_slice %136 {offsets = [0, 0], sizes = [8, 32], strides = [1, 1]} : vector<8x96xf32> to vector<8x32xf32>
    %138 = arith.negf %137 : vector<8x32xf32>
    %139 = math.exp %138 : vector<8x32xf32>
    %cst_49 = arith.constant 1.000000e+00 : f32
    %140 = vector.broadcast %cst_49 : f32 to vector<8x32xf32>
    %141 = arith.addf %140, %139 : vector<8x32xf32>
    %142 = arith.divf %140, %141 : vector<8x32xf32>
    %143 = vector.extract_strided_slice %136 {offsets = [0, 32], sizes = [8, 32], strides = [1, 1]} : vector<8x96xf32> to vector<8x32xf32>
    %144 = arith.negf %143 : vector<8x32xf32>
    %145 = math.exp %144 : vector<8x32xf32>
    %cst_50 = arith.constant 1.000000e+00 : f32
    %146 = vector.broadcast %cst_50 : f32 to vector<8x32xf32>
    %147 = arith.addf %146, %145 : vector<8x32xf32>
    %148 = arith.divf %146, %147 : vector<8x32xf32>
    %149 = vector.extract_strided_slice %136 {offsets = [0, 64], sizes = [8, 32], strides = [1, 1]} : vector<8x96xf32> to vector<8x32xf32>
    %150 = math.tanh %149 : vector<8x32xf32>
    %151 = arith.mulf %142, %150 : vector<8x32xf32>
    %152 = arith.addf %151, %133 : vector<8x32xf32>
    %153 = math.tanh %152 : vector<8x32xf32>
    %154 = arith.mulf %148, %153 : vector<8x32xf32>
    %155 = tpu.concatenate %152, %154 in 1 : vector<8x32xf32>, vector<8x32xf32> -> vector<8x64xf32>
    %156 = arith.index_cast %112 : i32 to index
    %c0_51 = arith.constant 0 : index
    %157 = vector.load %arg8[%156, %c0_51] : memref<24x64xf32, #tpu.memory_space<vmem>>, vector<8x64xf32>
    tpu.vector_store %arg8[%156, %c0_51], %155 {strides = array<i32>} : memref<24x64xf32, #tpu.memory_space<vmem>>, vector<8x64xf32>,
    %c0_i32_52 = arith.constant 0 : i32
    %158 = arith.addi %112, %c0_i32_52 : i32
    %159 = arith.index_cast %158 : i32 to index
    %160 = memref.load %arg1[%159] : memref<24xi32, #tpu.memory_space<smem>>
    %161 = vector.extract_strided_slice %155 {offsets = [0, 0], sizes = [1, 64], strides = [1, 1]} : vector<8x64xf32> to vector<1x64xf32>
    %162 = arith.index_cast %160 : i32 to index
    %c0_53 = arith.constant 0 : index
    %163 = vector.load %arg10[%162, %c0_53] : memref<200x64xf32, #tpu.memory_space<vmem>>, vector<1x64xf32>
    tpu.vector_store %arg10[%162, %c0_53], %161 {strides = array<i32>} : memref<200x64xf32, #tpu.memory_space<vmem>>, vector<1x64xf32>,
    %c1_i32_54 = arith.constant 1 : i32
    %164 = arith.addi %112, %c1_i32_54 : i32
    %165 = arith.index_cast %164 : i32 to index
    %166 = memref.load %arg1[%165] : memref<24xi32, #tpu.memory_space<smem>>
    %167 = vector.extract_strided_slice %155 {offsets = [1, 0], sizes = [1, 64], strides = [1, 1]} : vector<8x64xf32> to vector<1x64xf32>
    %168 = arith.index_cast %166 : i32 to index
    %c0_55 = arith.constant 0 : index
    %169 = vector.load %arg10[%168, %c0_55] : memref<200x64xf32, #tpu.memory_space<vmem>>, vector<1x64xf32>
    tpu.vector_store %arg10[%168, %c0_55], %167 {strides = array<i32>} : memref<200x64xf32, #tpu.memory_space<vmem>>, vector<1x64xf32>,
    %c2_i32_56 = arith.constant 2 : i32
    %170 = arith.addi %112, %c2_i32_56 : i32
    %171 = arith.index_cast %170 : i32 to index
    %172 = memref.load %arg1[%171] : memref<24xi32, #tpu.memory_space<smem>>
    %173 = vector.extract_strided_slice %155 {offsets = [2, 0], sizes = [1, 64], strides = [1, 1]} : vector<8x64xf32> to vector<1x64xf32>
    %174 = arith.index_cast %172 : i32 to index
    %c0_57 = arith.constant 0 : index
    %175 = vector.load %arg10[%174, %c0_57] : memref<200x64xf32, #tpu.memory_space<vmem>>, vector<1x64xf32>
    tpu.vector_store %arg10[%174, %c0_57], %173 {strides = array<i32>} : memref<200x64xf32, #tpu.memory_space<vmem>>, vector<1x64xf32>,
    %c3_i32_58 = arith.constant 3 : i32
    %176 = arith.addi %112, %c3_i32_58 : i32
    %177 = arith.index_cast %176 : i32 to index
    %178 = memref.load %arg1[%177] : memref<24xi32, #tpu.memory_space<smem>>
    %179 = vector.extract_strided_slice %155 {offsets = [3, 0], sizes = [1, 64], strides = [1, 1]} : vector<8x64xf32> to vector<1x64xf32>
    %180 = arith.index_cast %178 : i32 to index
    %c0_59 = arith.constant 0 : index
    %181 = vector.load %arg10[%180, %c0_59] : memref<200x64xf32, #tpu.memory_space<vmem>>, vector<1x64xf32>
    tpu.vector_store %arg10[%180, %c0_59], %179 {strides = array<i32>} : memref<200x64xf32, #tpu.memory_space<vmem>>, vector<1x64xf32>,
    %c4_i32_60 = arith.constant 4 : i32
    %182 = arith.addi %112, %c4_i32_60 : i32
    %183 = arith.index_cast %182 : i32 to index
    %184 = memref.load %arg1[%183] : memref<24xi32, #tpu.memory_space<smem>>
    %185 = vector.extract_strided_slice %155 {offsets = [4, 0], sizes = [1, 64], strides = [1, 1]} : vector<8x64xf32> to vector<1x64xf32>
    %186 = arith.index_cast %184 : i32 to index
    %c0_61 = arith.constant 0 : index
    %187 = vector.load %arg10[%186, %c0_61] : memref<200x64xf32, #tpu.memory_space<vmem>>, vector<1x64xf32>
    tpu.vector_store %arg10[%186, %c0_61], %185 {strides = array<i32>} : memref<200x64xf32, #tpu.memory_space<vmem>>, vector<1x64xf32>,
    %c5_i32_62 = arith.constant 5 : i32
    %188 = arith.addi %112, %c5_i32_62 : i32
    %189 = arith.index_cast %188 : i32 to index
    %190 = memref.load %arg1[%189] : memref<24xi32, #tpu.memory_space<smem>>
    %191 = vector.extract_strided_slice %155 {offsets = [5, 0], sizes = [1, 64], strides = [1, 1]} : vector<8x64xf32> to vector<1x64xf32>
    %192 = arith.index_cast %190 : i32 to index
    %c0_63 = arith.constant 0 : index
    %193 = vector.load %arg10[%192, %c0_63] : memref<200x64xf32, #tpu.memory_space<vmem>>, vector<1x64xf32>
    tpu.vector_store %arg10[%192, %c0_63], %191 {strides = array<i32>} : memref<200x64xf32, #tpu.memory_space<vmem>>, vector<1x64xf32>,
    %c6_i32_64 = arith.constant 6 : i32
    %194 = arith.addi %112, %c6_i32_64 : i32
    %195 = arith.index_cast %194 : i32 to index
    %196 = memref.load %arg1[%195] : memref<24xi32, #tpu.memory_space<smem>>
    %197 = vector.extract_strided_slice %155 {offsets = [6, 0], sizes = [1, 64], strides = [1, 1]} : vector<8x64xf32> to vector<1x64xf32>
    %198 = arith.index_cast %196 : i32 to index
    %c0_65 = arith.constant 0 : index
    %199 = vector.load %arg10[%198, %c0_65] : memref<200x64xf32, #tpu.memory_space<vmem>>, vector<1x64xf32>
    tpu.vector_store %arg10[%198, %c0_65], %197 {strides = array<i32>} : memref<200x64xf32, #tpu.memory_space<vmem>>, vector<1x64xf32>,
    %c7_i32_66 = arith.constant 7 : i32
    %200 = arith.addi %112, %c7_i32_66 : i32
    %201 = arith.index_cast %200 : i32 to index
    %202 = memref.load %arg1[%201] : memref<24xi32, #tpu.memory_space<smem>>
    %203 = vector.extract_strided_slice %155 {offsets = [7, 0], sizes = [1, 64], strides = [1, 1]} : vector<8x64xf32> to vector<1x64xf32>
    %204 = arith.index_cast %202 : i32 to index
    %c0_67 = arith.constant 0 : index
    %205 = vector.load %arg10[%204, %c0_67] : memref<200x64xf32, #tpu.memory_space<vmem>>, vector<1x64xf32>
    tpu.vector_store %arg10[%204, %c0_67], %203 {strides = array<i32>} : memref<200x64xf32, #tpu.memory_space<vmem>>, vector<1x64xf32>,
    %c2_i32_68 = arith.constant 2 : i32
    %c1_i32_69 = arith.constant 1 : i32
    %206 = arith.muli %c2_i32_68, %c1_i32_69 : i32
    %c0_i32_70 = arith.constant 0 : i32
    %207 = arith.addi %c0_i32_70, %206 : i32
    %c8_i32_71 = arith.constant 8 : i32
    %208 = arith.muli %207, %c8_i32_71 : i32
    %209 = tpu.assume_multiple %208, 8 : i32
    %c64_i32_72 = arith.constant 64 : i32
    %210 = arith.muli %207, %c64_i32_72 : i32
    %211 = tpu.assume_multiple %210, 64 : i32
    %212 = arith.index_cast %211 : i32 to index
    %c0_73 = arith.constant 0 : index
    %213 = vector.load %arg10[%212, %c0_73] : memref<200x64xf32, #tpu.memory_space<vmem>>, vector<64x64xf32>
    %214 = vector.extract_strided_slice %213 {offsets = [0, 0], sizes = [64, 32], strides = [1, 1]} : vector<64x64xf32> to vector<64x32xf32>
    %215 = vector.extract_strided_slice %213 {offsets = [0, 32], sizes = [64, 32], strides = [1, 1]} : vector<64x64xf32> to vector<64x32xf32>
    %216 = arith.index_cast %209 : i32 to index
    %c0_74 = arith.constant 0 : index
    %217 = vector.load %arg9[%216, %c0_74] : memref<24x128xf32, #tpu.memory_space<vmem>>, vector<8x128xf32>
    %cst_75 = arith.constant dense<0.000000e+00> : vector<64x128xf32>
    %218 = tpu.matmul %215, %9, %cst_75 {dimension_numbers = #tpu.dot_dimension_numbers<[1], [0], [0], [1], [0, 0, 1, 1], [], []>} : vector<64x32xf32>, vector<32x128xf32>, vector<64x128xf32> -> vector<64x128xf32>
    %219 = vector.extract_strided_slice %217 {offsets = [0, 96], sizes = [8, 32], strides = [1, 1]} : vector<8x128xf32> to vector<8x32xf32>
    %cst_76 = arith.constant dense<0.000000e+00> : vector<64x32xf32>
    %220 = tpu.matmul %11, %219, %cst_76 {dimension_numbers = #tpu.dot_dimension_numbers<[1], [0], [0], [1], [0, 0, 1, 1], [], []>} : vector<64x8xf32>, vector<8x32xf32>, vector<64x32xf32> -> vector<64x32xf32>
    %221 = vector.extract_strided_slice %218 {offsets = [0, 96], sizes = [64, 32], strides = [1, 1]} : vector<64x128xf32> to vector<64x32xf32>
    %222 = arith.addf %221, %220 : vector<64x32xf32>
    %223 = arith.negf %222 : vector<64x32xf32>
    %224 = math.exp %223 : vector<64x32xf32>
    %cst_77 = arith.constant 1.000000e+00 : f32
    %225 = vector.broadcast %cst_77 : f32 to vector<64x32xf32>
    %226 = arith.addf %225, %224 : vector<64x32xf32>
    %227 = arith.divf %225, %226 : vector<64x32xf32>
    %228 = arith.mulf %227, %214 : vector<64x32xf32>
    %cst_78 = arith.constant dense<0.000000e+00> : vector<8x128xf32>
    %229 = tpu.matmul %10, %218, %cst_78 {dimension_numbers = #tpu.dot_dimension_numbers<[1], [0], [0], [1], [0, 0, 1, 1], [], []>} : vector<8x64xf32>, vector<64x128xf32>, vector<8x128xf32> -> vector<8x128xf32>
    %cst_79 = arith.constant dense<0.000000e+00> : vector<8x32xf32>
    %230 = tpu.matmul %10, %228, %cst_79 {dimension_numbers = #tpu.dot_dimension_numbers<[1], [0], [0], [1], [0, 0, 1, 1], [], []>} : vector<8x64xf32>, vector<64x32xf32>, vector<8x32xf32> -> vector<8x32xf32>
    %231 = vector.extract_strided_slice %217 {offsets = [0, 0], sizes = [8, 96], strides = [1, 1]} : vector<8x128xf32> to vector<8x96xf32>
    %232 = vector.extract_strided_slice %229 {offsets = [0, 0], sizes = [8, 96], strides = [1, 1]} : vector<8x128xf32> to vector<8x96xf32>
    %233 = arith.addf %231, %232 : vector<8x96xf32>
    %234 = vector.extract_strided_slice %233 {offsets = [0, 0], sizes = [8, 32], strides = [1, 1]} : vector<8x96xf32> to vector<8x32xf32>
    %235 = arith.negf %234 : vector<8x32xf32>
    %236 = math.exp %235 : vector<8x32xf32>
    %cst_80 = arith.constant 1.000000e+00 : f32
    %237 = vector.broadcast %cst_80 : f32 to vector<8x32xf32>
    %238 = arith.addf %237, %236 : vector<8x32xf32>
    %239 = arith.divf %237, %238 : vector<8x32xf32>
    %240 = vector.extract_strided_slice %233 {offsets = [0, 32], sizes = [8, 32], strides = [1, 1]} : vector<8x96xf32> to vector<8x32xf32>
    %241 = arith.negf %240 : vector<8x32xf32>
    %242 = math.exp %241 : vector<8x32xf32>
    %cst_81 = arith.constant 1.000000e+00 : f32
    %243 = vector.broadcast %cst_81 : f32 to vector<8x32xf32>
    %244 = arith.addf %243, %242 : vector<8x32xf32>
    %245 = arith.divf %243, %244 : vector<8x32xf32>
    %246 = vector.extract_strided_slice %233 {offsets = [0, 64], sizes = [8, 32], strides = [1, 1]} : vector<8x96xf32> to vector<8x32xf32>
    %247 = math.tanh %246 : vector<8x32xf32>
    %248 = arith.mulf %239, %247 : vector<8x32xf32>
    %249 = arith.addf %248, %230 : vector<8x32xf32>
    %250 = math.tanh %249 : vector<8x32xf32>
    %251 = arith.mulf %245, %250 : vector<8x32xf32>
    %252 = tpu.concatenate %249, %251 in 1 : vector<8x32xf32>, vector<8x32xf32> -> vector<8x64xf32>
    %253 = arith.index_cast %209 : i32 to index
    %c0_82 = arith.constant 0 : index
    %254 = vector.load %arg8[%253, %c0_82] : memref<24x64xf32, #tpu.memory_space<vmem>>, vector<8x64xf32>
    tpu.vector_store %arg8[%253, %c0_82], %252 {strides = array<i32>} : memref<24x64xf32, #tpu.memory_space<vmem>>, vector<8x64xf32>,
    %c0_i32_83 = arith.constant 0 : i32
    %255 = arith.addi %209, %c0_i32_83 : i32
    %256 = arith.index_cast %255 : i32 to index
    %257 = memref.load %arg1[%256] : memref<24xi32, #tpu.memory_space<smem>>
    %258 = vector.extract_strided_slice %252 {offsets = [0, 0], sizes = [1, 64], strides = [1, 1]} : vector<8x64xf32> to vector<1x64xf32>
    %259 = arith.index_cast %257 : i32 to index
    %c0_84 = arith.constant 0 : index
    %260 = vector.load %arg10[%259, %c0_84] : memref<200x64xf32, #tpu.memory_space<vmem>>, vector<1x64xf32>
    tpu.vector_store %arg10[%259, %c0_84], %258 {strides = array<i32>} : memref<200x64xf32, #tpu.memory_space<vmem>>, vector<1x64xf32>,
    %c1_i32_85 = arith.constant 1 : i32
    %261 = arith.addi %209, %c1_i32_85 : i32
    %262 = arith.index_cast %261 : i32 to index
    %263 = memref.load %arg1[%262] : memref<24xi32, #tpu.memory_space<smem>>
    %264 = vector.extract_strided_slice %252 {offsets = [1, 0], sizes = [1, 64], strides = [1, 1]} : vector<8x64xf32> to vector<1x64xf32>
    %265 = arith.index_cast %263 : i32 to index
    %c0_86 = arith.constant 0 : index
    %266 = vector.load %arg10[%265, %c0_86] : memref<200x64xf32, #tpu.memory_space<vmem>>, vector<1x64xf32>
    tpu.vector_store %arg10[%265, %c0_86], %264 {strides = array<i32>} : memref<200x64xf32, #tpu.memory_space<vmem>>, vector<1x64xf32>,
    %c2_i32_87 = arith.constant 2 : i32
    %267 = arith.addi %209, %c2_i32_87 : i32
    %268 = arith.index_cast %267 : i32 to index
    %269 = memref.load %arg1[%268] : memref<24xi32, #tpu.memory_space<smem>>
    %270 = vector.extract_strided_slice %252 {offsets = [2, 0], sizes = [1, 64], strides = [1, 1]} : vector<8x64xf32> to vector<1x64xf32>
    %271 = arith.index_cast %269 : i32 to index
    %c0_88 = arith.constant 0 : index
    %272 = vector.load %arg10[%271, %c0_88] : memref<200x64xf32, #tpu.memory_space<vmem>>, vector<1x64xf32>
    tpu.vector_store %arg10[%271, %c0_88], %270 {strides = array<i32>} : memref<200x64xf32, #tpu.memory_space<vmem>>, vector<1x64xf32>,
    %c3_i32_89 = arith.constant 3 : i32
    %273 = arith.addi %209, %c3_i32_89 : i32
    %274 = arith.index_cast %273 : i32 to index
    %275 = memref.load %arg1[%274] : memref<24xi32, #tpu.memory_space<smem>>
    %276 = vector.extract_strided_slice %252 {offsets = [3, 0], sizes = [1, 64], strides = [1, 1]} : vector<8x64xf32> to vector<1x64xf32>
    %277 = arith.index_cast %275 : i32 to index
    %c0_90 = arith.constant 0 : index
    %278 = vector.load %arg10[%277, %c0_90] : memref<200x64xf32, #tpu.memory_space<vmem>>, vector<1x64xf32>
    tpu.vector_store %arg10[%277, %c0_90], %276 {strides = array<i32>} : memref<200x64xf32, #tpu.memory_space<vmem>>, vector<1x64xf32>,
    %c4_i32_91 = arith.constant 4 : i32
    %279 = arith.addi %209, %c4_i32_91 : i32
    %280 = arith.index_cast %279 : i32 to index
    %281 = memref.load %arg1[%280] : memref<24xi32, #tpu.memory_space<smem>>
    %282 = vector.extract_strided_slice %252 {offsets = [4, 0], sizes = [1, 64], strides = [1, 1]} : vector<8x64xf32> to vector<1x64xf32>
    %283 = arith.index_cast %281 : i32 to index
    %c0_92 = arith.constant 0 : index
    %284 = vector.load %arg10[%283, %c0_92] : memref<200x64xf32, #tpu.memory_space<vmem>>, vector<1x64xf32>
    tpu.vector_store %arg10[%283, %c0_92], %282 {strides = array<i32>} : memref<200x64xf32, #tpu.memory_space<vmem>>, vector<1x64xf32>,
    %c5_i32_93 = arith.constant 5 : i32
    %285 = arith.addi %209, %c5_i32_93 : i32
    %286 = arith.index_cast %285 : i32 to index
    %287 = memref.load %arg1[%286] : memref<24xi32, #tpu.memory_space<smem>>
    %288 = vector.extract_strided_slice %252 {offsets = [5, 0], sizes = [1, 64], strides = [1, 1]} : vector<8x64xf32> to vector<1x64xf32>
    %289 = arith.index_cast %287 : i32 to index
    %c0_94 = arith.constant 0 : index
    %290 = vector.load %arg10[%289, %c0_94] : memref<200x64xf32, #tpu.memory_space<vmem>>, vector<1x64xf32>
    tpu.vector_store %arg10[%289, %c0_94], %288 {strides = array<i32>} : memref<200x64xf32, #tpu.memory_space<vmem>>, vector<1x64xf32>,
    %c6_i32_95 = arith.constant 6 : i32
    %291 = arith.addi %209, %c6_i32_95 : i32
    %292 = arith.index_cast %291 : i32 to index
    %293 = memref.load %arg1[%292] : memref<24xi32, #tpu.memory_space<smem>>
    %294 = vector.extract_strided_slice %252 {offsets = [6, 0], sizes = [1, 64], strides = [1, 1]} : vector<8x64xf32> to vector<1x64xf32>
    %295 = arith.index_cast %293 : i32 to index
    %c0_96 = arith.constant 0 : index
    %296 = vector.load %arg10[%295, %c0_96] : memref<200x64xf32, #tpu.memory_space<vmem>>, vector<1x64xf32>
    tpu.vector_store %arg10[%295, %c0_96], %294 {strides = array<i32>} : memref<200x64xf32, #tpu.memory_space<vmem>>, vector<1x64xf32>,
    %c7_i32_97 = arith.constant 7 : i32
    %297 = arith.addi %209, %c7_i32_97 : i32
    %298 = arith.index_cast %297 : i32 to index
    %299 = memref.load %arg1[%298] : memref<24xi32, #tpu.memory_space<smem>>
    %300 = vector.extract_strided_slice %252 {offsets = [7, 0], sizes = [1, 64], strides = [1, 1]} : vector<8x64xf32> to vector<1x64xf32>
    %301 = arith.index_cast %299 : i32 to index
    %c0_98 = arith.constant 0 : index
    %302 = vector.load %arg10[%301, %c0_98] : memref<200x64xf32, #tpu.memory_space<vmem>>, vector<1x64xf32>
    tpu.vector_store %arg10[%301, %c0_98], %300 {strides = array<i32>} : memref<200x64xf32, #tpu.memory_space<vmem>>, vector<1x64xf32>,
    %c3_i32_99 = arith.constant 3 : i32
    return
  }
  func.func @transform_0(%arg0: i32, %arg1: memref<24xi32, #tpu.memory_space<smem>>) -> (i32, i32) {
    %c0_i32 = arith.constant 0 : i32
    %c0_i32_0 = arith.constant 0 : i32
    %c0_i32_1 = arith.constant 0 : i32
    return %c0_i32, %c0_i32_0 : i32, i32
  }
  func.func @transform_1(%arg0: i32, %arg1: memref<24xi32, #tpu.memory_space<smem>>) -> (i32, i32) {
    %c0_i32 = arith.constant 0 : i32
    %c0_i32_0 = arith.constant 0 : i32
    %c0_i32_1 = arith.constant 0 : i32
    return %c0_i32, %c0_i32_0 : i32, i32
  }
  func.func @transform_2(%arg0: i32, %arg1: memref<24xi32, #tpu.memory_space<smem>>) -> (i32, i32) {
    %c0_i32 = arith.constant 0 : i32
    %c0_i32_0 = arith.constant 0 : i32
    %c0_i32_1 = arith.constant 0 : i32
    return %c0_i32, %c0_i32_0 : i32, i32
  }
  func.func @transform_3(%arg0: i32, %arg1: memref<24xi32, #tpu.memory_space<smem>>) -> (i32, i32) {
    %c0_i32 = arith.constant 0 : i32
    %c0_i32_0 = arith.constant 0 : i32
    %c0_i32_1 = arith.constant 0 : i32
    return %c0_i32, %c0_i32_0 : i32, i32
  }
  func.func @transform_4(%arg0: i32, %arg1: memref<24xi32, #tpu.memory_space<smem>>) -> (i32, i32) {
    %c0_i32 = arith.constant 0 : i32
    %c0_i32_0 = arith.constant 0 : i32
    %c0_i32_1 = arith.constant 0 : i32
    return %c0_i32, %c0_i32_0 : i32, i32
  }
  func.func @transform_5(%arg0: i32, %arg1: memref<24xi32, #tpu.memory_space<smem>>) -> (i32, i32) {
    %c0_i32 = arith.constant 0 : i32
    %c0_i32_0 = arith.constant 0 : i32
    %c0_i32_1 = arith.constant 0 : i32
    return %c0_i32, %c0_i32_0 : i32, i32
  }
  func.func @transform_6(%arg0: i32, %arg1: memref<24xi32, #tpu.memory_space<smem>>) -> (i32, i32) {
    %c0_i32 = arith.constant 0 : i32
    %c0_i32_0 = arith.constant 0 : i32
    %c0_i32_1 = arith.constant 0 : i32
    return %c0_i32, %c0_i32_0 : i32, i32
  }
}

</mosaic_0001>

<bundles_post_ra>
// kernel: _tree_lstm_call.1
= control target key start
LH: loop header
LB: loop body
LE: loop exit
PB: predicated region body
PF: predicated region fallthrough
CT: control target
= control target key end

     0   :  { %s2698_s24 = smov [#allocation5]   ;;  %s3324_s0 = inlined_call_operand.hbm [shape: s32[24], index: 0, kind: input, shape index: {}]   ;;  %s3325_s1 = inlined_call_operand.hbm [shape: f32[24,32], index: 1, kind: input, shape index: {}]   ;;  %s3326_s2 = inlined_call_operand.vmem [shape: f32[32,128], index: 2, kind: input, shape index: {}]   ;;  %s3327_s3 = inlined_call_operand.vmem [shape: f32[32,128], index: 3, kind: input, shape index: {}]   ;;  %s3328_s4 = inlined_call_operand.vmem [shape: f32[1,128], index: 4, kind: input, shape index: {}]   ;;  %s3329_s5 = inlined_call_operand.vmem [shape: f32[8,64], index: 5, kind: input, shape index: {}]   ;;  %s3330_s6 = inlined_call_operand.vmem [shape: f32[64,8], index: 6, kind: input, shape index: {}]   ;;  %s3331_s7 = inlined_call_operand.hbm [shape: f32[24,64], index: 7, kind: output, shape index: {}]  }
   0x1   :  { %13 = dma.hbm_to_smem %s3324_s0, 16, %s2698_s24, [#allocation4] }
   0x2   :  { %2692 = dma.done.wait [#allocation4], 16 }
   0x3   :  { %2693 = vsyncadd [#allocation4], 4294967280 }
   0x4   :  { %15 = sfence }
   0x5   :  { %16 = vsyncpa [#allocation7], 0 }
   0x6   :  { %17 = vsyncpa [#allocation8], 0  ;;  %s2699_s27 = smov [#allocation6]  }
   0x7   :  { %s23_s28 = sshll.u32 %s2699_s27, 4  ;;  %s24_s28 = int_to_ptr.vmem [resolvable:$true] %s23_s28 }
   0x8   :  { %s2660_s29 = scalar_lea.vmem %s24_s28, 384  ;;  %p2665_p1 = scmp.lt.s32.totalorder %s24_s28, %s24_s28 }
   0x9   :  { %p2661_p0 = scmp.ne.s32.totalorder %s24_s28, %s2660_s29  ;;  %p2666_p2 = scmp.lt.s32.totalorder %s2660_s29, %s2660_s29 }
   0xb   :  { %p2667_p3 = por %p2666_p2, %p2665_p1 }
   0xd   :  { %p2668_p4 = pnand %p2667_p3, %p2661_p0 }
   0xf   :  { %2671 = shalt.err (!%p2668_p4)
}
  0x10   :  { %s2700_s30 = smov 128   ;;  %s2701_s8 = smov 8  }
  0x11   :  { %29 = dma.hbm_to_vmem [thread:$0]  %s3325_s1, 384, %s24_s28, [#allocation7], %s2700_s30, %s2700_s30, %s2701_s8  }
  0x12   :  { %2694 = dma.done.wait [#allocation7], 384  }
  0x13   :  { %2695 = vsyncadd [#allocation7], 4294966912  ;;  %v2702_v0 = vmov 0.0   ;;  %vm2703_vm0 = vmmov 0   ;;  %v75_v1 = vld [vmem:[%s3326_s2 + $0x18] sm:$0xff]  ;;  %v74_v2 = vld [vmem:[%s3326_s2 + $0x10] sm:$0xff] }
  0x14   :  { %2280 = vmatprep.subr.mxu0 %v2702_v0  ;;  %2288 = vmatprep.mubr.msk.f32.mxu0 %vm2703_vm0, %v2702_v0  ;;  %v73_v3 = vld [vmem:[%s3326_s2 + $0x8] sm:$0xff]  ;;  %v72_v4 = vld [vmem:[%s3326_s2] sm:$0xff]  ;;  %vm83_vm1 = vcmask 261120   ;;  %vm43_vm2 = vcmask 523264   ;;  %s2704_s2 = smov 96   ;;  %v70_v10 = vld [vmem:[#allocation6 + $0x8] sm:$0xff] }
  0x15   :  { %2281 = vmatpush3.msra.mxu0 %v75_v1  ;;  %v69_v5 = vld [vmem:[#allocation6] sm:$0xff]  ;;  %45 = vst.msk [vmem:[#allocation3 + $0x8] sm:$0xff] %vm43_vm2, %v2702_v0  ;;  %44 = vst.msk [vmem:[#allocation3] sm:$0xff] %vm43_vm2, %v2702_v0  ;;  %v2833_v11 = vld [vmem:[%s3327_s3 + $0x18] sm:$0xff]  ;;  %vm347_vm3 = vcmask 64512   ;;  %s2705_s29 = smov 32  }
  0x16   :  { %2282 = vmatprep.subr.mxu0 %v2702_v0  ;;  %46 = vst.msk [vmem:[#allocation3 + $0x10] sm:$0xff] %vm43_vm2, %v2702_v0  ;;  %47 = vst.msk [vmem:[#allocation3 + $0x18] sm:$0xff] %vm43_vm2, %v2702_v0  ;;  %2297 = vmatprep.subr.mxu1 %v2833_v11  ;;  %v2840_v12 = vld [vmem:[%s3327_s3 + $0x10] sm:$0xff]  ;;  %v71_v13 = vld [vmem:[#allocation6 + $0x10] sm:$0xff]  ;;  %s2706_s20 = smov 64   ;;  %s778_s21 = sld [smem:[#allocation5]] }
  0x17   :  { %2283 = vmatpush3.msra.mxu0 %v74_v2  ;;  %48 = vst.msk [vmem:[#allocation3 + $0x20] sm:$0xff] %vm43_vm2, %v2702_v0  ;;  %49 = vst.msk [vmem:[#allocation3 + $0x28] sm:$0xff] %vm43_vm2, %v2702_v0  ;;  %2298 = vmatpush3.msra.mxu1 %v2833_v11  ;;  %v2851_v14 = vld [vmem:[%s3327_s3 + $0x8] sm:$0xff]  ;;  %v2856_v15 = vld [vmem:[%s3330_s6] sm:$0xff]  ;;  %s2079_s22 = sld [smem:[#allocation5 + $0x1]]  ;;  %vm780_vm4 = vcmask 516096  }
  0x18   :  { %2284 = vmatprep.subr.mxu0 %v2702_v0  ;;  %50 = vst.msk [vmem:[#allocation3 + $0x30] sm:$0xff] %vm43_vm2, %v2702_v0  ;;  %51 = vst.msk [vmem:[#allocation3 + $0x38] sm:$0xff] %vm43_vm2, %v2702_v0  ;;  %2299 = vmatprep.subr.mxu1 %v2840_v12  ;;  %v2865_v16 = vld [vmem:[%s3327_s3] sm:$0xff]  ;;  %v2893_v31 = vld [vmem:[%s3330_s6 + $0x8] sm:$0xff]  ;;  %s2080_s23 = sld [smem:[#allocation5 + $0x2]]  ;;  %vm785_vm5 = vcmask 517121  }
  0x19   :  { %2285 = vmatpush3.msra.mxu0 %v73_v3  ;;  %52 = vst.msk [vmem:[#allocation3 + $0x40] sm:$0xff] %vm43_vm2, %v2702_v0  ;;  %53 = vst.msk [vmem:[#allocation3 + $0x48] sm:$0xff] %vm43_vm2, %v2702_v0  ;;  %2300 = vmatpush3.msra.mxu1 %v2840_v12  ;;  %v2873_v17 = vld [vmem:[%s3328_s4] ss:$0 sm:$0xff]  ;;  %v2900_v33 = vld [vmem:[%s3330_s6 + $0x10] sm:$0xff]  ;;  %s2081_s24 = sld [smem:[#allocation5 + $0x3]] }
  0x1a   :  { %2286 = vmatprep.subr.mxu0 %v2702_v0  ;;  %54 = vst.msk [vmem:[#allocation3 + $0x50] sm:$0xff] %vm43_vm2, %v2702_v0  ;;  %55 = vst.msk [vmem:[#allocation3 + $0x58] sm:$0xff] %vm43_vm2, %v2702_v0  ;;  %2301 = vmatprep.subr.mxu1 %v2851_v14  ;;  %v2912_v35 = vld [vmem:[%s3330_s6 + $0x18] sm:$0xff]  ;;  %v2919_v36 = vld [vmem:[%s3330_s6 + $0x20] sm:$0xff]  ;;  %s2082_s25 = sld [smem:[#allocation5 + $0x4]]  ;;  %vm790_vm6 = vcmask 518146  }
  0x1b   :  { %2287 = vmatpush3.msra.mxu0 %v72_v4  ;;  %56 = vst.msk [vmem:[#allocation3 + $0x60] sm:$0xff] %vm43_vm2, %v2702_v0  ;;  %57 = vst.msk [vmem:[#allocation3 + $0x68] sm:$0xff] %vm43_vm2, %v2702_v0  ;;  %2302 = vmatpush3.msra.mxu1 %v2851_v14  ;;  %v2936_v39 = vld [vmem:[%s3330_s6 + $0x28] sm:$0xff]  ;;  %v2941_v40 = vld [vmem:[%s3330_s6 + $0x30] sm:$0xff]  ;;  %s2083_s26 = sld [smem:[#allocation5 + $0x5]]  ;;  %vm795_vm7 = vcmask 519171  }
  0x1c   :  { %2289 = vmatmul.mubr.msk.f32.vlgmr.msra.gmra.mxu0 %vm83_vm1, %v69_v5  ;;  %58 = vst.msk [vmem:[#allocation3 + $0x70] sm:$0xff] %vm43_vm2, %v2702_v0  ;;  %59 = vst.msk [vmem:[#allocation3 + $0x78] sm:$0xff] %vm43_vm2, %v2702_v0  ;;  %v190_v6 = vld [vmem:[#allocation3 + $0x8] sm:$0xff]  ;;  %2303 = vmatprep.subr.mxu1 %v2865_v16  ;;  %v189_v21 = vld [vmem:[#allocation3] sm:$0xff]  ;;  %s2084_s27 = sld [smem:[#allocation5 + $0x6]]  ;;  %s779_s3 = scalar_lea.vmem [#allocation3], %s778_s21 }
  0x1d   :  { %2291 = vmatprep.mubr.msk.f32.mxu0 %vm2703_vm0, %v2702_v0  ;;  %60 = vst.msk [vmem:[#allocation3 + $0x80] sm:$0xff] %vm43_vm2, %v2702_v0  ;;  %61 = vst.msk [vmem:[#allocation3 + $0x88] sm:$0xff] %vm43_vm2, %v2702_v0  ;;  %208 = vrot.lane.b32.xlu1 %v190_v6, %s2704_s2  ;;  %v191_v7 = vld [vmem:[#allocation3 + $0x10] sm:$0xff]  ;;  %v192_v22 = vld [vmem:[#allocation3 + $0x18] sm:$0xff]  ;;  %s2085_s28 = sld [smem:[#allocation5 + $0x7]]  ;;  %s784_s4 = scalar_lea.vmem [#allocation3], %s2079_s22 }
  0x1e   :  { %62 = vst.msk [vmem:[#allocation3 + $0x90] sm:$0xff] %vm43_vm2, %v2702_v0  ;;  %63 = vst.msk [vmem:[#allocation3 + $0x98] sm:$0xff] %vm43_vm2, %v2702_v0  ;;  %v193_v8 = vld [vmem:[#allocation3 + $0x20] sm:$0xff]  ;;  %2304 = vmatpush3.msra.mxu1 %v2865_v16  ;;  %v194_v23 = vld [vmem:[#allocation3 + $0x28] sm:$0xff]  ;;  %vm800_vm8 = vcmask 520196   ;;  %s789_s0 = scalar_lea.vmem [#allocation3], %s2080_s23 }
  0x1f   :  { %64 = vst.msk [vmem:[#allocation3 + $0xa0] sm:$0xff] %vm43_vm2, %v2702_v0  ;;  %65 = vst.msk [vmem:[#allocation3 + $0xa8] sm:$0xff] %vm43_vm2, %v2702_v0  ;;  %v195_v9 = vld [vmem:[#allocation3 + $0x30] sm:$0xff]  ;;  %2331 = vmatprep.subr.mxu1 %v2702_v0  ;;  %v196_v24 = vld [vmem:[#allocation3 + $0x38] sm:$0xff]  ;;  %vm805_vm9 = vcmask 521221   ;;  %s794_s9 = scalar_lea.vmem [#allocation3], %s2081_s24 }
  0x20   :  { %66 = vst.msk [vmem:[#allocation3 + $0xb0] sm:$0xff] %vm43_vm2, %v2702_v0  ;;  %67 = vst.msk [vmem:[#allocation3 + $0xb8] sm:$0xff] %vm43_vm2, %v2702_v0  ;;  %2292 = vmatmul.mubr.msk.f32.gmra.mxu0 %vm83_vm1, %v70_v10  ;;  %v2956_v42 = vld [vmem:[%s3330_s6 + $0x38] sm:$0xff]  ;;  %v2996_v61 = vld [vmem:[%s3329_s5] sm:$0xff]  ;;  %vm810_vm10 = vcmask 522246   ;;  %s799_s10 = scalar_lea.vmem [#allocation3], %s2082_s25 }
  0x21   :  { %210 = vrot.lane.b32.xlu1 %v191_v7, %s2704_s2  ;;  %2294 = vmatprep.mubr.msk.f32.mxu0 %vm2703_vm0, %v2702_v0  ;;  %vm815_vm11 = vcmask 523271   ;;  %s804_s11 = scalar_lea.vmem [#allocation3], %s2083_s26  ;;  %s2113_s1 = sld [smem:[#allocation5 + $0x8]] }
  0x22   :  { %s809_s12 = scalar_lea.vmem [#allocation3], %s2084_s27  ;;  %s2114_s14 = sld [smem:[#allocation5 + $0x9]] }
  0x23   :  { %s814_s13 = scalar_lea.vmem [#allocation3], %s2085_s28  ;;  %s2115_s15 = sld [smem:[#allocation5 + $0xa]] }
  0x24   :  { %2295 = vmatmul.mubr.msk.f32.gmra.mxu0 %vm83_vm1, %v71_v13  ;;  %s2116_s16 = sld [smem:[#allocation5 + $0xb]] }
  0x25   :  { %214 = vrot.lane.b32.xlu1 %v193_v8, %s2704_s2  ;;  %2319 = vmatprep.mubr.msk.f32.mxu0 %vm347_vm3, %v2856_v15  ;;  %s2117_s17 = sld [smem:[#allocation5 + $0xc]] }
  0x26   :  { %s2118_s18 = sld [smem:[#allocation5 + $0xd]] }
  0x27   :  { %s2119_s6 = sld [smem:[#allocation5 + $0xe]]  ;;  %s1382_s21 = scalar_lea.vmem [#allocation3], %s2113_s1 }
  0x28   :  { %s2120_s19 = sld [smem:[#allocation5 + $0xf]]  ;;  %s1386_s22 = scalar_lea.vmem [#allocation3], %s2114_s14 }
  0x29   :  { %218 = vrot.lane.b32.xlu1 %v195_v9, %s2704_s2  ;;  %s1390_s23 = scalar_lea.vmem [#allocation3], %s2115_s15  ;;  %s3303_s1 = sld [smem:[#allocation5 + $0x17]] }
  0x2a   :  { %s1394_s24 = scalar_lea.vmem [#allocation3], %s2116_s16 }
  0x2b   :  { %s1398_s25 = scalar_lea.vmem [#allocation3], %s2117_s17 }
  0x2c   :  { %s1402_s26 = scalar_lea.vmem [#allocation3], %s2118_s18 }
  0x2d   :  { %s1406_s27 = scalar_lea.vmem [#allocation3], %s2119_s6 }
  0x2e   :  { %s1410_s28 = scalar_lea.vmem [#allocation3], %s2120_s19 }
  0x8f   :  { %v2888_v29 = vpop.permute.xlu1 %208 }
  0x93   :  { %v2895_v32 = vpop.permute.xlu1 %210 }
  0x97   :  { %v2923_v37 = vpop.permute.xlu1 %214 }
  0x9b   :  { %v2958_v43 = vpop.permute.xlu1 %218 }
  0xdc   :  { %v159_v18 = vpop.f32.mrf.mxu0 }
  0xdd   :  { %v2876_v19 = vadd.f32 %v2873_v17, %v159_v18 }
  0xde   :  { %v2290_v20 = vpop.f32.mrf.mxu0 }
  0xdf   :  { %344 = vrot.lane.b32.xlu0 %v2876_v19, %s2705_s29 }
  0xe0   :  { %v2884_v25 = vpop.f32.mrf.mxu0 }
  0xe2   :  { %v2293_v26 = vpop.f32.mrf.mxu0 }
  0xe3   :  { %206 = vrot.lane.b32.xlu0 %v189_v21, %s2704_s2 }
  0xe4   :  { %v2886_v27 = vpop.f32.mrf.mxu0 }
  0xe6   :  { %v2296_v28 = vpop.f32.mrf.mxu0 }
  0xe7   :  { %212 = vrot.lane.b32.xlu0 %v192_v22, %s2704_s2 }
  0xeb   :  { %216 = vrot.lane.b32.xlu0 %v194_v23, %s2704_s2 }
  0xef   :  { %220 = vrot.lane.b32.xlu0 %v196_v24, %s2704_s2 }
 0x151   :  { %v345_v30 = vpop.permute.xlu0 %344 }
 0x152   :  { %2317 = vmatprep.subr.mxu0 %v345_v30 }
 0x153   :  { %2318 = vmatpush3.msra.mxu0 %v345_v30 }
 0x154   :  { %2320 = vmatmul.mubr.msk.f32.vlgmr.msra.gmra.mxu0 %vm347_vm3, %v2893_v31  ;;  %2350 = vmatprep.subr.mxu0 %v2702_v0 }
 0x155   :  { %v2905_v34 = vpop.permute.xlu0 %206  ;;  %2322 = vmatprep.mubr.msk.f32.mxu0 %vm347_vm3, %v2900_v33 }
 0x156   :  { %2305 = vmatprep.mubr.msk.f32.mxu1 %vm83_vm1, %v2905_v34 }
 0x157   :  { %2306 = vmatmul.mubr.msk.f32.vlgmr.msra.gmra.mxu1 %vm83_vm1, %v2888_v29 }
 0x158   :  { %2323 = vmatmul.mubr.msk.f32.gmra.mxu0 %vm347_vm3, %v2912_v35  ;;  %2308 = vmatprep.mubr.msk.f32.mxu1 %vm83_vm1, %v2895_v32 }
 0x159   :  { %v2929_v38 = vpop.permute.xlu0 %212  ;;  %2325 = vmatprep.mubr.msk.f32.mxu0 %vm347_vm3, %v2919_v36 }
 0x15b   :  { %2309 = vmatmul.mubr.msk.f32.gmra.mxu1 %vm83_vm1, %v2929_v38 }
 0x15c   :  { %2326 = vmatmul.mubr.msk.f32.gmra.mxu0 %vm347_vm3, %v2936_v39  ;;  %2311 = vmatprep.mubr.msk.f32.mxu1 %vm83_vm1, %v2923_v37 }
 0x15d   :  { %v2949_v41 = vpop.permute.xlu0 %216  ;;  %2328 = vmatprep.mubr.msk.f32.mxu0 %vm347_vm3, %v2941_v40 }
 0x15f   :  { %2312 = vmatmul.mubr.msk.f32.gmra.mxu1 %vm83_vm1, %v2949_v41 }
 0x160   :  { %2329 = vmatmul.mubr.msk.f32.gmra.mxu0 %vm347_vm3, %v2956_v42  ;;  %2314 = vmatprep.mubr.msk.f32.mxu1 %vm83_vm1, %v2958_v43 }
 0x161   :  { %v2966_v44 = vpop.permute.xlu0 %220  ;;  %2366 = vmatprep.mubr.msk.f32.mxu0 %vm2703_vm0, %v2702_v0 }
 0x163   :  { %2315 = vmatmul.mubr.msk.f32.gmra.mxu1 %vm83_vm1, %v2966_v44 }
 0x164   :  { %2347 = vmatprep.mubr.msk.f32.mxu1 %vm2703_vm0, %v2702_v0 }
 0x214   :  { %v2321_v45 = vpop.f32.mrf.mxu0 }
 0x216   :  { %v438_v46 = vpop.f32.mrf.mxu0 }
 0x217   :  { %v2974_v47 = vpop.f32.mrf.mxu1 }
 0x218   :  { %v2324_v48 = vpop.f32.mrf.mxu0 }
 0x219   :  { %v2976_v49 = vpop.f32.mrf.mxu1 }
 0x21a   :  { %v448_v50 = vpop.f32.mrf.mxu0 }
 0x21b   :  { %v2310_v51 = vpop.f32.mrf.mxu1 }
 0x21c   :  { %v2327_v52 = vpop.f32.mrf.mxu0 }
 0x21d   :  { %v314_v53 = vpop.f32.mrf.mxu1 }
 0x21e   :  { %v458_v54 = vpop.f32.mrf.mxu0 }
 0x21f   :  { %v2313_v55 = vpop.f32.mrf.mxu1 }
 0x220   :  { %v2330_v56 = vpop.f32.mrf.mxu0 }
 0x221   :  { %499 = vrot.lane.b32.xlu1 %v2330_v56, %s2704_s2  ;;  %v324_v57 = vpop.f32.mrf.mxu1 }
 0x222   :  { %v468_v58 = vpop.f32.mrf.mxu0 }
 0x223   :  { %497 = vrot.lane.b32.xlu0 %v468_v58, %s2704_s2  ;;  %v2316_v59 = vpop.f32.mrf.mxu1 }
 0x224   :  { %2332 = vmatpush3.msra.mxu1 %v2316_v59 }
 0x225   :  { %495 = vrot.lane.b32.xlu1 %v2327_v52, %s2704_s2  ;;  %v334_v60 = vpop.f32.mrf.mxu1  ;;  %2333 = vmatprep.subr.mxu1 %v2702_v0 }
 0x226   :  { %2334 = vmatpush3.msra.mxu1 %v334_v60 }
 0x227   :  { %493 = vrot.lane.b32.xlu0 %v458_v54, %s2704_s2  ;;  %2335 = vmatprep.subr.mxu1 %v2702_v0 }
 0x228   :  { %2336 = vmatpush3.msra.mxu1 %v2313_v55 }
 0x229   :  { %491 = vrot.lane.b32.xlu1 %v2324_v48, %s2704_s2  ;;  %2337 = vmatprep.subr.mxu1 %v2702_v0 }
 0x22a   :  { %2338 = vmatpush3.msra.mxu1 %v324_v57 }
 0x22b   :  { %489 = vrot.lane.b32.xlu0 %v448_v50, %s2704_s2  ;;  %2339 = vmatprep.subr.mxu1 %v2702_v0 }
 0x22c   :  { %2340 = vmatpush3.msra.mxu1 %v2310_v51 }
 0x22d   :  { %487 = vrot.lane.b32.xlu1 %v2321_v45, %s2704_s2  ;;  %2341 = vmatprep.subr.mxu1 %v2702_v0 }
 0x22e   :  { %2342 = vmatpush3.msra.mxu1 %v314_v53 }
 0x22f   :  { %485 = vrot.lane.b32.xlu0 %v438_v46, %s2704_s2  ;;  %2343 = vmatprep.subr.mxu1 %v2702_v0 }
 0x230   :  { %2344 = vmatpush3.msra.mxu1 %v2974_v47 }
 0x231   :  { %2345 = vmatprep.subr.mxu1 %v2702_v0 }
 0x232   :  { %2346 = vmatpush3.msra.mxu1 %v2976_v49 }
 0x233   :  { %2348 = vmatmul.mubr.msk.f32.vlgmr.msra.gmra.mxu1 %vm43_vm2, %v2996_v61  ;;  %2369 = vmatprep.subr.mxu1 %v2833_v11 }
 0x234   :  { %2370 = vmatpush3.msra.mxu1 %v2833_v11 }
 0x235   :  { %2371 = vmatprep.subr.mxu1 %v2840_v12 }
 0x236   :  { %2372 = vmatpush3.msra.mxu1 %v2840_v12 }
 0x237   :  { %2373 = vmatprep.subr.mxu1 %v2851_v14 }
 0x238   :  { %2374 = vmatpush3.msra.mxu1 %v2851_v14 }
 0x239   :  { %2375 = vmatprep.subr.mxu1 %v2865_v16 }
 0x23a   :  { %2376 = vmatpush3.msra.mxu1 %v2865_v16 }
 0x23b   :  { %2403 = vmatprep.subr.mxu1 %v2702_v0 }
 0x293   :  { %v500_v62 = vpop.permute.xlu1 %499 }
 0x294   :  { %v516_v63 = vadd.f32 %v2316_v59, %v500_v62 }
 0x295   :  { %v498_v1 = vpop.permute.xlu0 %497 }
 0x296   :  { %v2075_v2 = vmul.f32 -1.442695, %v516_v63  ;;  %v515_v3 = vadd.f32 %v498_v1, %v334_v60 }
 0x297   :  { %v496_v4 = vpop.permute.xlu1 %495 }
 0x298   :  { %2523 = vpow2.f32 %v2075_v2  ;;  %v2074_v5 = vmul.f32 -1.442695, %v515_v3  ;;  %v514_v6 = vadd.f32 %v2313_v55, %v496_v4 }
 0x299   :  { %v494_v7 = vpop.permute.xlu0 %493 }
 0x29a   :  { %2525 = vpow2.f32 %v2074_v5  ;;  %v2073_v8 = vmul.f32 -1.442695, %v514_v6  ;;  %v513_v9 = vadd.f32 %v494_v7, %v324_v57 }
 0x29b   :  { %v492_v10 = vpop.permute.xlu1 %491 }
 0x29c   :  { %2527 = vpow2.f32 %v2073_v8  ;;  %v2072_v13 = vmul.f32 -1.442695, %v513_v9  ;;  %v512_v18 = vadd.f32 %v2310_v51, %v492_v10 }
 0x29d   :  { %v490_v20 = vpop.permute.xlu0 %489 }
 0x29e   :  { %2529 = vpow2.f32 %v2072_v13  ;;  %v2071_v21 = vmul.f32 -1.442695, %v512_v18  ;;  %v511_v22 = vadd.f32 %v490_v20, %v314_v53 }
 0x29f   :  { %v488_v23 = vpop.permute.xlu1 %487 }
 0x2a0   :  { %2531 = vpow2.f32 %v2071_v21  ;;  %v2070_v24 = vmul.f32 -1.442695, %v511_v22  ;;  %v510_v26 = vadd.f32 %v2974_v47, %v488_v23 }
 0x2a1   :  { %v486_v28 = vpop.permute.xlu0 %485 }
 0x2a2   :  { %2533 = vpow2.f32 %v2070_v24  ;;  %v2069_v30 = vmul.f32 -1.442695, %v510_v26  ;;  %v509_v45 = vadd.f32 %v486_v28, %v2976_v49 }
 0x2a4   :  { %2535 = vpow2.f32 %v2069_v30  ;;  %v2068_v46 = vmul.f32 -1.442695, %v509_v45 }
 0x2a5   :  { %v2524_v48 = vpop.eup %2523 }
 0x2a6   :  { %v548_v50 = vadd.f32 1.0, %v2524_v48  ;;  %2537 = vpow2.f32 %v2068_v46 }
 0x2a7   :  { %v2526_v51 = vpop.eup %2525 }
 0x2a8   :  { %2539 = vrcp.f32 %v548_v50  ;;  %v547_v52 = vadd.f32 1.0, %v2526_v51 }
 0x2a9   :  { %v2528_v54 = vpop.eup %2527 }
 0x2aa   :  { %2541 = vrcp.f32 %v547_v52  ;;  %v546_v53 = vadd.f32 1.0, %v2528_v54 }
 0x2ab   :  { %v2530_v55 = vpop.eup %2529 }
 0x2ac   :  { %2543 = vrcp.f32 %v546_v53  ;;  %v545_v56 = vadd.f32 1.0, %v2530_v55 }
 0x2ad   :  { %v2532_v47 = vpop.eup %2531 }
 0x2ae   :  { %2545 = vrcp.f32 %v545_v56  ;;  %v544_v57 = vadd.f32 1.0, %v2532_v47 }
 0x2af   :  { %v2534_v58 = vpop.eup %2533 }
 0x2b0   :  { %2547 = vrcp.f32 %v544_v57  ;;  %v543_v49 = vadd.f32 1.0, %v2534_v58 }
 0x2b1   :  { %v2536_v59 = vpop.eup %2535 }
 0x2b2   :  { %2549 = vrcp.f32 %v543_v49  ;;  %v542_v60 = vadd.f32 1.0, %v2536_v59 }
 0x2b3   :  { %v2538_v62 = vpop.eup %2537 }
 0x2b4   :  { %2551 = vrcp.f32 %v542_v60  ;;  %v541_v63 = vadd.f32 1.0, %v2538_v62 }
 0x2b5   :  { %v2540_v1 = vpop.eup %2539 }
 0x2b6   :  { %2553 = vrcp.f32 %v541_v63  ;;  %v580_v2 = vmul.f32 %v2540_v1, %v2966_v44 }
 0x2b7   :  { %v2542_v3 = vpop.eup %2541 }
 0x2b8   :  { %676 = vrot.lane.b32.xlu1 %v580_v2, %s2705_s29  ;;  %v579_v4 = vmul.f32 %v2542_v3, %v2958_v43 }
 0x2b9   :  { %v2544_v5 = vpop.eup %2543 }
 0x2ba   :  { %674 = vrot.lane.b32.xlu0 %v579_v4, %s2705_s29  ;;  %v578_v6 = vmul.f32 %v2544_v5, %v2949_v41 }
 0x2bb   :  { %v2546_v7 = vpop.eup %2545 }
 0x2bc   :  { %672 = vrot.lane.b32.xlu1 %v578_v6, %s2705_s29  ;;  %v577_v8 = vmul.f32 %v2546_v7, %v2923_v37 }
 0x2bd   :  { %v2548_v9 = vpop.eup %2547 }
 0x2be   :  { %670 = vrot.lane.b32.xlu0 %v577_v8, %s2705_s29  ;;  %v576_v44 = vmul.f32 %v2548_v9, %v2929_v38 }
 0x2bf   :  { %v2550_v10 = vpop.eup %2549 }
 0x2c0   :  { %668 = vrot.lane.b32.xlu1 %v576_v44, %s2705_s29  ;;  %v575_v43 = vmul.f32 %v2550_v10, %v2895_v32  ;;  %v3033_v32 = vadd.f32 %v2873_v17, %v2884_v25 }
 0x2c1   :  { %v2552_v13 = vpop.eup %2551 }
 0x2c2   :  { %666 = vrot.lane.b32.xlu0 %v575_v43, %s2705_s29  ;;  %v574_v41 = vmul.f32 %v2552_v13, %v2888_v29 }
 0x2c3   :  { %v2554_v18 = vpop.eup %2553 }
 0x2c4   :  { %664 = vrot.lane.b32.xlu1 %v574_v41, %s2705_s29  ;;  %v573_v37 = vmul.f32 %v2554_v18, %v2905_v34 }
 0x2c6   :  { %662 = vrot.lane.b32.xlu0 %v573_v37, %s2705_s29 }
 0x2f3   :  { %v650_v20 = vpop.f32.mrf.mxu1 }
 0x2f4   :  { %v756_v38 = vadd.f32 %v650_v20, %v2876_v19 }
 0x2f5   :  { %v2349_v21 = vpop.f32.mrf.mxu1 }
 0x2f6   :  { %2555 = vtanh.f32 %v756_v38  ;;  %v2078_v46 = vmul.f32 -1.442695, %v756_v38 }
 0x2f8   :  { %2557 = vpow2.f32 %v2078_v46 }
 0x303   :  { %v2556_v22 = vpop.eup %2555 }
 0x304   :  { %765 = vrot.lane.b32.xlu1 %v2556_v22, %s2706_s20 }
 0x305   :  { %v2558_v48 = vpop.eup %2557 }
 0x306   :  { %v760_v50 = vadd.f32 1.0, %v2558_v48 }
 0x308   :  { %974 = vrot.lane.b32.xlu1 %v3033_v32, %s2705_s29  ;;  %2559 = vrcp.f32 %v760_v50 }
 0x315   :  { %v2560_v51 = vpop.eup %2559 }
 0x32a   :  { %v677_v29 = vpop.permute.xlu1 %676 }
 0x32b   :  { %2351 = vmatpush3.msra.mxu0 %v677_v29 }
 0x32c   :  { %2352 = vmatprep.subr.mxu0 %v2702_v0  ;;  %v675_v34 = vpop.permute.xlu0 %674 }
 0x32d   :  { %2353 = vmatpush3.msra.mxu0 %v675_v34 }
 0x32e   :  { %v673_v19 = vpop.permute.xlu1 %672  ;;  %2354 = vmatprep.subr.mxu0 %v2702_v0 }
 0x32f   :  { %2355 = vmatpush3.msra.mxu0 %v673_v19 }
 0x330   :  { %2356 = vmatprep.subr.mxu0 %v2702_v0  ;;  %v671_v23 = vpop.permute.xlu0 %670 }
 0x331   :  { %2357 = vmatpush3.msra.mxu0 %v671_v23 }
 0x332   :  { %v669_v24 = vpop.permute.xlu1 %668  ;;  %2358 = vmatprep.subr.mxu0 %v2702_v0 }
 0x333   :  { %2359 = vmatpush3.msra.mxu0 %v669_v24 }
 0x334   :  { %2360 = vmatprep.subr.mxu0 %v2702_v0  ;;  %v667_v25 = vpop.permute.xlu0 %666 }
 0x335   :  { %2361 = vmatpush3.msra.mxu0 %v667_v25 }
 0x336   :  { %v665_v26 = vpop.permute.xlu1 %664  ;;  %2362 = vmatprep.subr.mxu0 %v2702_v0 }
 0x337   :  { %2363 = vmatpush3.msra.mxu0 %v665_v26 }
 0x338   :  { %2364 = vmatprep.subr.mxu0 %v2702_v0  ;;  %v663_v28 = vpop.permute.xlu0 %662 }
 0x339   :  { %2365 = vmatpush3.msra.mxu0 %v663_v28 }
 0x33a   :  { %2367 = vmatmul.mubr.msk.f32.vlgmr.msra.gmra.mxu0 %vm43_vm2, %v2996_v61 }
 0x33b   :  { %2391 = vmatprep.mubr.msk.f32.mxu0 %vm347_vm3, %v2856_v15 }
 0x376   :  { %v766_v30 = vpop.permute.xlu1 %765 }
 0x377   :  { %v768_v52 = vmul.f32 %v2560_v51, %v766_v30 }
 0x37a   :  { %v975_v45 = vpop.permute.xlu1 %974 }
 0x37b   :  { %2389 = vmatprep.subr.mxu0 %v975_v45 }
 0x37c   :  { %2390 = vmatpush3.msra.mxu0 %v975_v45 }
 0x37d   :  { %2392 = vmatmul.mubr.msk.f32.vlgmr.msra.gmra.mxu0 %vm347_vm3, %v2893_v31  ;;  %2422 = vmatprep.subr.mxu0 %v2702_v0 }
 0x37e   :  { %2394 = vmatprep.mubr.msk.f32.mxu0 %vm347_vm3, %v2900_v33 }
 0x381   :  { %2395 = vmatmul.mubr.msk.f32.gmra.mxu0 %vm347_vm3, %v2912_v35 }
 0x382   :  { %2397 = vmatprep.mubr.msk.f32.mxu0 %vm347_vm3, %v2919_v36 }
 0x385   :  { %2398 = vmatmul.mubr.msk.f32.gmra.mxu0 %vm347_vm3, %v2936_v39 }
 0x386   :  { %2400 = vmatprep.mubr.msk.f32.mxu0 %vm347_vm3, %v2941_v40 }
 0x389   :  { %2401 = vmatmul.mubr.msk.f32.gmra.mxu0 %vm347_vm3, %v2956_v42 }
 0x38a   :  { %2438 = vmatprep.mubr.msk.f32.mxu0 %vm2703_vm0, %v2702_v0 }
 0x3fa   :  { %v752_v54 = vpop.f32.mrf.mxu0 }
 0x3fb   :  { %v769_v53 = vadd.f32 %v768_v52, %v752_v54 }
 0x3fc   :  { %v2368_v55 = vpop.f32.mrf.mxu0 }
 0x3fd   :  { %2561 = vtanh.f32 %v769_v53 }
 0x40a   :  { %v2562_v56 = vpop.eup %2561 }
 0x40b   :  { %772 = vrot.lane.b32.xlu0 %v2562_v56, %s2705_s29 }
 0x43d   :  { %v2393_v60 = vpop.f32.mrf.mxu0 }
 0x43f   :  { %v1043_v62 = vpop.f32.mrf.mxu0 }
 0x441   :  { %v2396_v2 = vpop.f32.mrf.mxu0 }
 0x443   :  { %v1053_v3 = vpop.f32.mrf.mxu0 }
 0x445   :  { %v2399_v6 = vpop.f32.mrf.mxu0 }
 0x447   :  { %v1063_v7 = vpop.f32.mrf.mxu0 }
 0x449   :  { %v2402_v44 = vpop.f32.mrf.mxu0 }
 0x44b   :  { %v1073_v10 = vpop.f32.mrf.mxu0 }
 0x47d   :  { %v773_v47 = vpop.permute.xlu0 %772 }
 0x47e   :  { %v775_v57 = vmul.f32 %v2560_v51, %v773_v47 }
 0x480   :  { %v776_v58 = vsel %vm83_vm1, %v769_v53, %v775_v57 }
 0x481   :  { %777 = vst.msk [vmem:[#allocation9] sm:$0xff] %vm43_vm2, %v776_v58 }
 0x482   :  { %781 = vst.msk [vmem:[%s779_s3] sm:$0x1] %vm780_vm4, %v776_v58 }
 0x483   :  { %786 = vst.msk [vmem:[%s784_s4 - $0x1] sm:$0x2] %vm785_vm5, %v776_v58  ;;  %s2149_s4 = sld [smem:[#allocation5 + $0x11]] }
 0x484   :  { %791 = vst.msk [vmem:[%s789_s0 - $0x2] sm:$0x4] %vm790_vm6, %v776_v58  ;;  %s2150_s0 = sld [smem:[#allocation5 + $0x12]] }
 0x485   :  { %796 = vst.msk [vmem:[%s794_s9 - $0x3] sm:$0x8] %vm795_vm7, %v776_v58  ;;  %s2151_s9 = sld [smem:[#allocation5 + $0x13]] }
 0x486   :  { %801 = vst.msk [vmem:[%s799_s10 - $0x4] sm:$0x10] %vm800_vm8, %v776_v58  ;;  %s3299_s10 = sld [smem:[#allocation5 + $0x15]] }
 0x487   :  { %806 = vst.msk [vmem:[%s804_s11 - $0x5] sm:$0x20] %vm805_vm9, %v776_v58  ;;  %s3301_s11 = sld [smem:[#allocation5 + $0x16]] }
 0x488   :  { %811 = vst.msk [vmem:[%s809_s12 - $0x6] sm:$0x40] %vm810_vm10, %v776_v58  ;;  %s2707_s12 = smov [#allocation9]  }
 0x489   :  { %816 = vst.msk [vmem:[%s814_s13 - $0x7] sm:$0x80] %vm815_vm11, %v776_v58  ;;  %s2012_s13 = sshll.u32 %s2707_s12, 4  ;;  %s2013_s13 = int_to_ptr.vmem [resolvable:$true] %s2012_s13 }
 0x48a   :  { %s2672_s15 = scalar_lea.vmem %s2013_s13, 384  ;;  %p2677_p6 = scmp.lt.s32.totalorder %s2013_s13, %s2013_s13 }
 0x48b   :  { %p2673_p5 = scmp.ne.s32.totalorder %s2013_s13, %s2672_s15  ;;  %p2678_p7 = scmp.lt.s32.totalorder %s2672_s15, %s2672_s15 }
 0x48d   :  { %p2679_p8 = por %p2678_p7, %p2677_p6 }
 0x48f   :  { %p2680_p9 = pnand %p2679_p8, %p2673_p5 }
 0x490   :  { %v819_v49 = vld [vmem:[#allocation3 + $0x48] sm:$0xff]  ;;  %v818_v59 = vld [vmem:[#allocation3 + $0x40] sm:$0xff]  ;;  %v821_v63 = vld [vmem:[#allocation3 + $0x58] sm:$0xff] }
 0x491   :  { %838 = vrot.lane.b32.xlu1 %v819_v49, %s2704_s2  ;;  %836 = vrot.lane.b32.xlu0 %v818_v59, %s2704_s2  ;;  %v820_v1 = vld [vmem:[#allocation3 + $0x50] sm:$0xff]  ;;  %v823_v4 = vld [vmem:[#allocation3 + $0x68] sm:$0xff]  ;;  %v822_v5 = vld [vmem:[#allocation3 + $0x60] sm:$0xff] }
 0x492   :  { %v825_v8 = vld [vmem:[#allocation3 + $0x78] sm:$0xff]  ;;  %v824_v9 = vld [vmem:[#allocation3 + $0x70] sm:$0xff] }
 0x495   :  { %842 = vrot.lane.b32.xlu1 %v821_v63, %s2704_s2  ;;  %840 = vrot.lane.b32.xlu0 %v820_v1, %s2704_s2 }
 0x499   :  { %846 = vrot.lane.b32.xlu1 %v823_v4, %s2704_s2  ;;  %844 = vrot.lane.b32.xlu0 %v822_v5, %s2704_s2 }
 0x49d   :  { %850 = vrot.lane.b32.xlu1 %v825_v8, %s2704_s2  ;;  %848 = vrot.lane.b32.xlu0 %v824_v9, %s2704_s2 }
 0x4a1   :  { %1104 = vrot.lane.b32.xlu0 %v2402_v44, %s2704_s2  ;;  %1102 = vrot.lane.b32.xlu1 %v1073_v10, %s2704_s2 }
 0x4a5   :  { %1100 = vrot.lane.b32.xlu0 %v2399_v6, %s2704_s2  ;;  %1098 = vrot.lane.b32.xlu1 %v1063_v7, %s2704_s2 }
 0x4a9   :  { %1096 = vrot.lane.b32.xlu0 %v2396_v2, %s2704_s2  ;;  %1094 = vrot.lane.b32.xlu1 %v1053_v3, %s2704_s2 }
 0x4ad   :  { %1092 = vrot.lane.b32.xlu0 %v2393_v60, %s2704_s2  ;;  %1090 = vrot.lane.b32.xlu1 %v1043_v62, %s2704_s2 }
 0x503   :  { %v3092_v43 = vpop.permute.xlu1 %838  ;;  %v3094_v13 = vpop.permute.xlu0 %836 }
 0x504   :  { %2377 = vmatprep.mubr.msk.f32.mxu1 %vm83_vm1, %v3094_v13 }
 0x505   :  { %2378 = vmatmul.mubr.msk.f32.vlgmr.msra.gmra.mxu1 %vm83_vm1, %v3092_v43 }
 0x507   :  { %v3100_v41 = vpop.permute.xlu1 %842  ;;  %v3102_v18 = vpop.permute.xlu0 %840 }
 0x508   :  { %2380 = vmatprep.mubr.msk.f32.mxu1 %vm83_vm1, %v3102_v18 }
 0x509   :  { %2381 = vmatmul.mubr.msk.f32.gmra.mxu1 %vm83_vm1, %v3100_v41 }
 0x50b   :  { %v3108_v37 = vpop.permute.xlu1 %846  ;;  %v3110_v20 = vpop.permute.xlu0 %844 }
 0x50c   :  { %2383 = vmatprep.mubr.msk.f32.mxu1 %vm83_vm1, %v3110_v20 }
 0x50d   :  { %2384 = vmatmul.mubr.msk.f32.gmra.mxu1 %vm83_vm1, %v3108_v37 }
 0x50f   :  { %v3116_v38 = vpop.permute.xlu1 %850  ;;  %v3118_v21 = vpop.permute.xlu0 %848 }
 0x510   :  { %2386 = vmatprep.mubr.msk.f32.mxu1 %vm83_vm1, %v3118_v21 }
 0x511   :  { %2387 = vmatmul.mubr.msk.f32.gmra.mxu1 %vm83_vm1, %v3116_v38 }
 0x512   :  { %2419 = vmatprep.mubr.msk.f32.mxu1 %vm2703_vm0, %v2702_v0 }
 0x513   :  { %v1105_v22 = vpop.permute.xlu0 %1104  ;;  %v1103_v29 = vpop.permute.xlu1 %1102 }
 0x517   :  { %v1101_v34 = vpop.permute.xlu0 %1100  ;;  %v1099_v24 = vpop.permute.xlu1 %1098 }
 0x51b   :  { %v1097_v26 = vpop.permute.xlu0 %1096  ;;  %v1095_v46 = vpop.permute.xlu1 %1094 }
 0x51f   :  { %v1093_v54 = vpop.permute.xlu0 %1092  ;;  %v1091_v62 = vpop.permute.xlu1 %1090 }
 0x5c5   :  { %v2379_v19 = vpop.f32.mrf.mxu1 }
 0x5c6   :  { %v1115_v49 = vadd.f32 %v2379_v19, %v1093_v54 }
 0x5c7   :  { %v934_v23 = vpop.f32.mrf.mxu1 }
 0x5c8   :  { %v1114_v63 = vadd.f32 %v1091_v62, %v934_v23  ;;  %v2103_v3 = vmul.f32 -1.442695, %v1115_v49 }
 0x5c9   :  { %v2382_v25 = vpop.f32.mrf.mxu1 }
 0x5ca   :  { %v1117_v48 = vadd.f32 %v2382_v25, %v1097_v26  ;;  %v2102_v4 = vmul.f32 -1.442695, %v1114_v63 }
 0x5cb   :  { %v944_v28 = vpop.f32.mrf.mxu1 }
 0x5cc   :  { %v1116_v55 = vadd.f32 %v1095_v46, %v944_v28  ;;  %v2105_v57 = vmul.f32 -1.442695, %v1117_v48 }
 0x5cd   :  { %v2385_v30 = vpop.f32.mrf.mxu1 }
 0x5ce   :  { %v1119_v45 = vadd.f32 %v2385_v30, %v1101_v34  ;;  %v2104_v1 = vmul.f32 -1.442695, %v1116_v55 }
 0x5cf   :  { %v954_v50 = vpop.f32.mrf.mxu1 }
 0x5d0   :  { %v2107_v51 = vmul.f32 -1.442695, %v1119_v45  ;;  %v1118_v52 = vadd.f32 %v1099_v24, %v954_v50 }
 0x5d1   :  { %v2388_v53 = vpop.f32.mrf.mxu1 }
 0x5d2   :  { %v2106_v56 = vmul.f32 -1.442695, %v1118_v52  ;;  %v1121_v47 = vadd.f32 %v2388_v53, %v1105_v22  ;;  %2404 = vmatpush3.msra.mxu1 %v2388_v53  ;;  %2563 = vpow2.f32 %v2107_v51 }
 0x5d3   :  { %v964_v58 = vpop.f32.mrf.mxu1  ;;  %2405 = vmatprep.subr.mxu1 %v2702_v0 }
 0x5d4   :  { %v2109_v59 = vmul.f32 -1.442695, %v1121_v47  ;;  %v1120_v60 = vadd.f32 %v1103_v29, %v964_v58  ;;  %2406 = vmatpush3.msra.mxu1 %v964_v58  ;;  %2565 = vpow2.f32 %v2106_v56 }
 0x5d5   :  { %2407 = vmatprep.subr.mxu1 %v2702_v0 }
 0x5d6   :  { %2567 = vpow2.f32 %v2109_v59  ;;  %v2108_v2 = vmul.f32 -1.442695, %v1120_v60  ;;  %2408 = vmatpush3.msra.mxu1 %v2385_v30  ;;  %v3175_v60 = vadd.f32 %v2873_v17, %v2886_v27 }
 0x5d7   :  { %2569 = vpow2.f32 %v2105_v57  ;;  %2409 = vmatprep.subr.mxu1 %v2702_v0 }
 0x5d8   :  { %2571 = vpow2.f32 %v2108_v2  ;;  %2410 = vmatpush3.msra.mxu1 %v954_v50 }
 0x5d9   :  { %2411 = vmatprep.subr.mxu1 %v2702_v0  ;;  %2573 = vpow2.f32 %v2104_v1 }
 0x5da   :  { %2412 = vmatpush3.msra.mxu1 %v2382_v25  ;;  %2575 = vpow2.f32 %v2103_v3 }
 0x5db   :  { %2413 = vmatprep.subr.mxu1 %v2702_v0  ;;  %2577 = vpow2.f32 %v2102_v4 }
 0x5dc   :  { %2414 = vmatpush3.msra.mxu1 %v944_v28 }
 0x5dd   :  { %2415 = vmatprep.subr.mxu1 %v2702_v0 }
 0x5de   :  { %2416 = vmatpush3.msra.mxu1 %v2379_v19 }
 0x5df   :  { %2417 = vmatprep.subr.mxu1 %v2702_v0  ;;  %v2564_v5 = vpop.eup %2563 }
 0x5e0   :  { %2418 = vmatpush3.msra.mxu1 %v934_v23  ;;  %v1151_v8 = vadd.f32 1.0, %v2564_v5 }
 0x5e1   :  { %2420 = vmatmul.mubr.msk.f32.vlgmr.msra.gmra.mxu1 %vm43_vm2, %v2996_v61  ;;  %2441 = vmatprep.subr.mxu1 %v2833_v11  ;;  %v2566_v6 = vpop.eup %2565 }
 0x5e2   :  { %2442 = vmatpush3.msra.mxu1 %v2833_v11  ;;  %v1150_v22 = vadd.f32 1.0, %v2566_v6 }
 0x5e3   :  { %v2568_v7 = vpop.eup %2567  ;;  %2443 = vmatprep.subr.mxu1 %v2840_v12 }
 0x5e4   :  { %v2570_v9 = vpop.eup %2569  ;;  %v1153_v44 = vadd.f32 1.0, %v2568_v7  ;;  %2444 = vmatpush3.msra.mxu1 %v2840_v12 }
 0x5e5   :  { %v2572_v10 = vpop.eup %2571  ;;  %2445 = vmatprep.subr.mxu1 %v2851_v14  ;;  %v1149_v11 = vadd.f32 1.0, %v2570_v9 }
 0x5e6   :  { %2579 = vrcp.f32 %v1153_v44  ;;  %v1152_v29 = vadd.f32 1.0, %v2572_v10  ;;  %2446 = vmatpush3.msra.mxu1 %v2851_v14  ;;  %v2574_v34 = vpop.eup %2573 }
 0x5e7   :  { %2581 = vrcp.f32 %v1151_v8  ;;  %2447 = vmatprep.subr.mxu1 %v2865_v16  ;;  %v2576_v19 = vpop.eup %2575  ;;  %v1148_v12 = vadd.f32 1.0, %v2574_v34 }
 0x5e8   :  { %2583 = vrcp.f32 %v1152_v29  ;;  %2448 = vmatpush3.msra.mxu1 %v2865_v16  ;;  %v2578_v23 = vpop.eup %2577  ;;  %v1147_v24 = vadd.f32 1.0, %v2576_v19 }
 0x5e9   :  { %2475 = vmatprep.subr.mxu1 %v2702_v0  ;;  %2585 = vrcp.f32 %v1150_v22  ;;  %v1146_v25 = vadd.f32 1.0, %v2578_v23 }
 0x5ea   :  { %2587 = vrcp.f32 %v1149_v11 }
 0x5eb   :  { %2589 = vrcp.f32 %v1148_v12 }
 0x5ec   :  { %2591 = vrcp.f32 %v1147_v24 }
 0x5ed   :  { %2593 = vrcp.f32 %v1146_v25 }
 0x5f3   :  { %v2580_v14 = vpop.eup %2579 }
 0x5f4   :  { %v2582_v26 = vpop.eup %2581  ;;  %v1185_v28 = vmul.f32 %v2580_v14, %v3116_v38 }
 0x5f5   :  { %v2584_v30 = vpop.eup %2583  ;;  %v1183_v46 = vmul.f32 %v2582_v26, %v3108_v37 }
 0x5f6   :  { %1278 = vrot.lane.b32.xlu0 %v1185_v28, %s2705_s29  ;;  %v1184_v16 = vmul.f32 %v2584_v30, %v3118_v21  ;;  %v2586_v45 = vpop.eup %2585 }
 0x5f7   :  { %v2588_v48 = vpop.eup %2587  ;;  %v1182_v50 = vmul.f32 %v2586_v45, %v3110_v20 }
 0x5f8   :  { %1276 = vrot.lane.b32.xlu1 %v1184_v16, %s2705_s29  ;;  %v2590_v51 = vpop.eup %2589  ;;  %v1181_v38 = vmul.f32 %v2588_v48, %v3100_v41 }
 0x5f9   :  { %v2592_v52 = vpop.eup %2591  ;;  %v1180_v21 = vmul.f32 %v2590_v51, %v3102_v18 }
 0x5fa   :  { %1274 = vrot.lane.b32.xlu0 %v1183_v46, %s2705_s29  ;;  %v2594_v54 = vpop.eup %2593  ;;  %v1179_v37 = vmul.f32 %v2592_v52, %v3092_v43 }
 0x5fb   :  { %v1178_v53 = vmul.f32 %v2594_v54, %v3094_v13 }
 0x5fc   :  { %1272 = vrot.lane.b32.xlu1 %v1182_v50, %s2705_s29 }
 0x5fe   :  { %1270 = vrot.lane.b32.xlu0 %v1181_v38, %s2705_s29 }
 0x600   :  { %1268 = vrot.lane.b32.xlu1 %v1180_v21, %s2705_s29 }
 0x602   :  { %1266 = vrot.lane.b32.xlu0 %v1179_v37, %s2705_s29 }
 0x604   :  { %1264 = vrot.lane.b32.xlu1 %v1178_v53, %s2705_s29 }
 0x668   :  { %v1279_v20 = vpop.permute.xlu0 %1278 }
 0x669   :  { %2423 = vmatpush3.msra.mxu0 %v1279_v20 }
 0x66a   :  { %2424 = vmatprep.subr.mxu0 %v2702_v0  ;;  %v1277_v41 = vpop.permute.xlu1 %1276 }
 0x66b   :  { %2425 = vmatpush3.msra.mxu0 %v1277_v41 }
 0x66c   :  { %v1275_v55 = vpop.permute.xlu0 %1274  ;;  %2426 = vmatprep.subr.mxu0 %v2702_v0 }
 0x66d   :  { %2427 = vmatpush3.msra.mxu0 %v1275_v55 }
 0x66e   :  { %2428 = vmatprep.subr.mxu0 %v2702_v0  ;;  %v1273_v18 = vpop.permute.xlu1 %1272 }
 0x66f   :  { %2429 = vmatpush3.msra.mxu0 %v1273_v18 }
 0x670   :  { %v1271_v43 = vpop.permute.xlu0 %1270  ;;  %2430 = vmatprep.subr.mxu0 %v2702_v0 }
 0x671   :  { %2431 = vmatpush3.msra.mxu0 %v1271_v43 }
 0x672   :  { %2432 = vmatprep.subr.mxu0 %v2702_v0  ;;  %v1269_v13 = vpop.permute.xlu1 %1268 }
 0x673   :  { %2433 = vmatpush3.msra.mxu0 %v1269_v13 }
 0x674   :  { %v1267_v56 = vpop.permute.xlu0 %1266  ;;  %2434 = vmatprep.subr.mxu0 %v2702_v0 }
 0x675   :  { %2435 = vmatpush3.msra.mxu0 %v1267_v56 }
 0x676   :  { %2436 = vmatprep.subr.mxu0 %v2702_v0  ;;  %v1265_v47 = vpop.permute.xlu1 %1264 }
 0x677   :  { %2437 = vmatpush3.msra.mxu0 %v1265_v47 }
 0x678   :  { %2439 = vmatmul.mubr.msk.f32.vlgmr.msra.gmra.mxu0 %vm43_vm2, %v2996_v61 }
 0x679   :  { %2463 = vmatprep.mubr.msk.f32.mxu0 %vm347_vm3, %v2856_v15 }
 0x6a1   :  { %v1252_v57 = vpop.f32.mrf.mxu1 }
 0x6a2   :  { %v1358_v58 = vadd.f32 %v1252_v57, %v3033_v32 }
 0x6a3   :  { %v2421_v49 = vpop.f32.mrf.mxu1 }
 0x6a4   :  { %2595 = vtanh.f32 %v1358_v58  ;;  %v2112_v62 = vmul.f32 -1.442695, %v1358_v58 }
 0x6a6   :  { %2597 = vpow2.f32 %v2112_v62 }
 0x6b1   :  { %v2596_v59 = vpop.eup %2595 }
 0x6b2   :  { %1367 = vrot.lane.b32.xlu0 %v2596_v59, %s2706_s20 }
 0x6b3   :  { %v2598_v61 = vpop.eup %2597 }
 0x6b4   :  { %v1362_v15 = vadd.f32 1.0, %v2598_v61 }
 0x6b6   :  { %1569 = vrot.lane.b32.xlu0 %v3175_v60, %s2705_s29  ;;  %2599 = vrcp.f32 %v1362_v15 }
 0x6c3   :  { %v2600_v17 = vpop.eup %2599 }
 0x724   :  { %v1368_v63 = vpop.permute.xlu0 %1367 }
 0x725   :  { %v1370_v27 = vmul.f32 %v2600_v17, %v1368_v63 }
 0x728   :  { %v1570_v1 = vpop.permute.xlu0 %1569 }
 0x729   :  { %2461 = vmatprep.subr.mxu0 %v1570_v1 }
 0x72a   :  { %2462 = vmatpush3.msra.mxu0 %v1570_v1 }
 0x72b   :  { %2464 = vmatmul.mubr.msk.f32.vlgmr.msra.gmra.mxu0 %vm347_vm3, %v2893_v31  ;;  %2494 = vmatprep.subr.mxu0 %v2702_v0 }
 0x72c   :  { %2466 = vmatprep.mubr.msk.f32.mxu0 %vm347_vm3, %v2900_v33 }
 0x72f   :  { %2467 = vmatmul.mubr.msk.f32.gmra.mxu0 %vm347_vm3, %v2912_v35 }
 0x730   :  { %2469 = vmatprep.mubr.msk.f32.mxu0 %vm347_vm3, %v2919_v36 }
 0x733   :  { %2470 = vmatmul.mubr.msk.f32.gmra.mxu0 %vm347_vm3, %v2936_v39 }
 0x734   :  { %2472 = vmatprep.mubr.msk.f32.mxu0 %vm347_vm3, %v2941_v40 }
 0x737   :  { %2473 = vmatmul.mubr.msk.f32.gmra.mxu0 %vm347_vm3, %v2956_v42 }
 0x738   :  { %v1354_v31 = vpop.f32.mrf.mxu0  ;;  %2510 = vmatprep.mubr.msk.f32.mxu0 %vm2703_vm0, %v2702_v0 }
 0x739   :  { %v1371_v33 = vadd.f32 %v1370_v27, %v1354_v31 }
 0x73a   :  { %v2440_v35 = vpop.f32.mrf.mxu0 }
 0x73b   :  { %2601 = vtanh.f32 %v1371_v33  ;;  %v3267_v35 = vld [vmem:[%s3329_s5] sm:$0xff]  ;;  %s2148_s5 = sld [smem:[#allocation5 + $0x10]] }
 0x741   :  { %s1977_s14 = scalar_lea.vmem [#allocation3], %s2148_s5 }
 0x748   :  { %v2602_v32 = vpop.eup %2601 }
 0x749   :  { %1374 = vrot.lane.b32.xlu1 %v2602_v32, %s2705_s29 }
 0x7bb   :  { %v1375_v36 = vpop.permute.xlu1 %1374 }
 0x7bc   :  { %v1377_v39 = vmul.f32 %v2600_v17, %v1375_v36 }
 0x7be   :  { %v1378_v40 = vsel %vm83_vm1, %v1371_v33, %v1377_v39 }
 0x7bf   :  { %1380 = vst.msk [vmem:[#allocation9 + $0x8] sm:$0xff] %vm43_vm2, %v1378_v40 }
 0x7c0   :  { %1383 = vst.msk [vmem:[%s1382_s21] sm:$0x1] %vm780_vm4, %v1378_v40 }
 0x7c1   :  { %1387 = vst.msk [vmem:[%s1386_s22 - $0x1] sm:$0x2] %vm785_vm5, %v1378_v40 }
 0x7c2   :  { %1391 = vst.msk [vmem:[%s1390_s23 - $0x2] sm:$0x4] %vm790_vm6, %v1378_v40 }
 0x7c3   :  { %1395 = vst.msk [vmem:[%s1394_s24 - $0x3] sm:$0x8] %vm795_vm7, %v1378_v40 }
 0x7c4   :  { %1399 = vst.msk [vmem:[%s1398_s25 - $0x4] sm:$0x10] %vm800_vm8, %v1378_v40 }
 0x7c5   :  { %1403 = vst.msk [vmem:[%s1402_s26 - $0x5] sm:$0x20] %vm805_vm9, %v1378_v40 }
 0x7c6   :  { %1407 = vst.msk [vmem:[%s1406_s27 - $0x6] sm:$0x40] %vm810_vm10, %v1378_v40 }
 0x7c7   :  { %1411 = vst.msk [vmem:[%s1410_s28 - $0x7] sm:$0x80] %vm815_vm11, %v1378_v40 }
 0x7ce   :  { %v1414_v42 = vld [vmem:[#allocation3 + $0x88] sm:$0xff]  ;;  %v1413_v2 = vld [vmem:[#allocation3 + $0x80] sm:$0xff]  ;;  %v1416_v3 = vld [vmem:[#allocation3 + $0x98] sm:$0xff] }
 0x7cf   :  { %1433 = vrot.lane.b32.xlu0 %v1414_v42, %s2704_s2  ;;  %1431 = vrot.lane.b32.xlu1 %v1413_v2, %s2704_s2  ;;  %v1415_v4 = vld [vmem:[#allocation3 + $0x90] sm:$0xff]  ;;  %v1418_v5 = vld [vmem:[#allocation3 + $0xa8] sm:$0xff]  ;;  %v1417_v6 = vld [vmem:[#allocation3 + $0xa0] sm:$0xff] }
 0x7d0   :  { %v1420_v7 = vld [vmem:[#allocation3 + $0xb8] sm:$0xff]  ;;  %v1419_v8 = vld [vmem:[#allocation3 + $0xb0] sm:$0xff] }
 0x7d3   :  { %1437 = vrot.lane.b32.xlu0 %v1416_v3, %s2704_s2  ;;  %1435 = vrot.lane.b32.xlu1 %v1415_v4, %s2704_s2 }
 0x7d7   :  { %1441 = vrot.lane.b32.xlu0 %v1418_v5, %s2704_s2  ;;  %1439 = vrot.lane.b32.xlu1 %v1417_v6, %s2704_s2 }
 0x7db   :  { %1445 = vrot.lane.b32.xlu0 %v1420_v7, %s2704_s2  ;;  %1443 = vrot.lane.b32.xlu1 %v1419_v8, %s2704_s2 }
 0x7eb   :  { %v2465_v9 = vpop.f32.mrf.mxu0 }
 0x7ed   :  { %v1638_v44 = vpop.f32.mrf.mxu0 }
 0x7ef   :  { %v2468_v10 = vpop.f32.mrf.mxu0 }
 0x7f1   :  { %v1648_v22 = vpop.f32.mrf.mxu0 }
 0x7f3   :  { %v2471_v29 = vpop.f32.mrf.mxu0 }
 0x7f5   :  { %v1658_v34 = vpop.f32.mrf.mxu0 }
 0x7f7   :  { %v2474_v11 = vpop.f32.mrf.mxu0 }
 0x7f8   :  { %1699 = vrot.lane.b32.xlu1 %v2474_v11, %s2704_s2 }
 0x7f9   :  { %v1668_v19 = vpop.f32.mrf.mxu0 }
 0x7fa   :  { %1697 = vrot.lane.b32.xlu0 %v1668_v19, %s2704_s2 }
 0x7fc   :  { %1695 = vrot.lane.b32.xlu1 %v2471_v29, %s2704_s2 }
 0x7fe   :  { %1693 = vrot.lane.b32.xlu0 %v1658_v34, %s2704_s2 }
 0x800   :  { %1691 = vrot.lane.b32.xlu1 %v2468_v10, %s2704_s2 }
 0x802   :  { %1689 = vrot.lane.b32.xlu0 %v1648_v22, %s2704_s2 }
 0x804   :  { %1687 = vrot.lane.b32.xlu1 %v2465_v9, %s2704_s2 }
 0x806   :  { %1685 = vrot.lane.b32.xlu0 %v1638_v44, %s2704_s2 }
 0x841   :  { %v3223_v12 = vpop.permute.xlu0 %1433  ;;  %v3225_v23 = vpop.permute.xlu1 %1431 }
 0x842   :  { %2449 = vmatprep.mubr.msk.f32.mxu1 %vm83_vm1, %v3225_v23 }
 0x843   :  { %2450 = vmatmul.mubr.msk.f32.vlgmr.msra.gmra.mxu1 %vm83_vm1, %v3223_v12 }
 0x845   :  { %v3231_v24 = vpop.permute.xlu0 %1437  ;;  %v3233_v25 = vpop.permute.xlu1 %1435 }
 0x846   :  { %2452 = vmatprep.mubr.msk.f32.mxu1 %vm83_vm1, %v3233_v25 }
 0x847   :  { %2453 = vmatmul.mubr.msk.f32.gmra.mxu1 %vm83_vm1, %v3231_v24 }
 0x849   :  { %v3239_v14 = vpop.permute.xlu0 %1441  ;;  %v3241_v26 = vpop.permute.xlu1 %1439 }
 0x84a   :  { %2455 = vmatprep.mubr.msk.f32.mxu1 %vm83_vm1, %v3241_v26 }
 0x84b   :  { %2456 = vmatmul.mubr.msk.f32.gmra.mxu1 %vm83_vm1, %v3239_v14 }
 0x84d   :  { %v3247_v28 = vpop.permute.xlu0 %1445  ;;  %v3249_v30 = vpop.permute.xlu1 %1443 }
 0x84e   :  { %2458 = vmatprep.mubr.msk.f32.mxu1 %vm83_vm1, %v3249_v30 }
 0x84f   :  { %2459 = vmatmul.mubr.msk.f32.gmra.mxu1 %vm83_vm1, %v3247_v28 }
 0x850   :  { %2491 = vmatprep.mubr.msk.f32.mxu1 %vm2703_vm0, %v2702_v0 }
 0x86a   :  { %v1700_v16 = vpop.permute.xlu1 %1699 }
 0x86c   :  { %v1698_v45 = vpop.permute.xlu0 %1697 }
 0x86e   :  { %v1696_v46 = vpop.permute.xlu1 %1695 }
 0x870   :  { %v1694_v51 = vpop.permute.xlu0 %1693 }
 0x872   :  { %v1692_v52 = vpop.permute.xlu1 %1691 }
 0x874   :  { %v1690_v53 = vpop.permute.xlu0 %1689 }
 0x876   :  { %v1688_v43 = vpop.permute.xlu1 %1687 }
 0x878   :  { %v1686_v63 = vpop.permute.xlu0 %1685 }
 0x903   :  { %v2451_v48 = vpop.f32.mrf.mxu1 }
 0x904   :  { %v1710_v59 = vadd.f32 %v2451_v48, %v1688_v43 }
 0x905   :  { %v1529_v50 = vpop.f32.mrf.mxu1 }
 0x906   :  { %v1709_v15 = vadd.f32 %v1686_v63, %v1529_v50  ;;  %v2138_v27 = vmul.f32 -1.442695, %v1710_v59 }
 0x907   :  { %v2454_v38 = vpop.f32.mrf.mxu1 }
 0x908   :  { %v1712_v20 = vadd.f32 %v2454_v38, %v1692_v52  ;;  %v2137_v31 = vmul.f32 -1.442695, %v1709_v15 }
 0x909   :  { %v1539_v21 = vpop.f32.mrf.mxu1 }
 0x90a   :  { %v1711_v56 = vadd.f32 %v1690_v53, %v1539_v21  ;;  %v2140_v58 = vmul.f32 -1.442695, %v1712_v20 }
 0x90b   :  { %v2457_v54 = vpop.f32.mrf.mxu1 }
 0x90c   :  { %v1714_v37 = vadd.f32 %v2457_v54, %v1696_v46  ;;  %v2139_v1 = vmul.f32 -1.442695, %v1711_v56 }
 0x90d   :  { %v1549_v41 = vpop.f32.mrf.mxu1 }
 0x90e   :  { %v2142_v55 = vmul.f32 -1.442695, %v1714_v37  ;;  %v1713_v18 = vadd.f32 %v1694_v51, %v1549_v41 }
 0x90f   :  { %v2460_v13 = vpop.f32.mrf.mxu1 }
 0x910   :  { %v2141_v47 = vmul.f32 -1.442695, %v1713_v18  ;;  %v1716_v57 = vadd.f32 %v2460_v13, %v1700_v16  ;;  %2476 = vmatpush3.msra.mxu1 %v2460_v13  ;;  %2603 = vpow2.f32 %v2142_v55 }
 0x911   :  { %v1559_v49 = vpop.f32.mrf.mxu1  ;;  %2477 = vmatprep.subr.mxu1 %v2702_v0 }
 0x912   :  { %v2144_v62 = vmul.f32 -1.442695, %v1716_v57  ;;  %v1715_v61 = vadd.f32 %v1698_v45, %v1559_v49  ;;  %2478 = vmatpush3.msra.mxu1 %v1559_v49  ;;  %2605 = vpow2.f32 %v2141_v47 }
 0x913   :  { %2479 = vmatprep.subr.mxu1 %v2702_v0 }
 0x914   :  { %2607 = vpow2.f32 %v2144_v62  ;;  %v2143_v17 = vmul.f32 -1.442695, %v1715_v61  ;;  %2480 = vmatpush3.msra.mxu1 %v2457_v54 }
 0x915   :  { %2609 = vpow2.f32 %v2140_v58  ;;  %2481 = vmatprep.subr.mxu1 %v2702_v0 }
 0x916   :  { %2611 = vpow2.f32 %v2143_v17  ;;  %2482 = vmatpush3.msra.mxu1 %v1549_v41 }
 0x917   :  { %2483 = vmatprep.subr.mxu1 %v2702_v0  ;;  %2613 = vpow2.f32 %v2139_v1 }
 0x918   :  { %2484 = vmatpush3.msra.mxu1 %v2454_v38  ;;  %2615 = vpow2.f32 %v2138_v27 }
 0x919   :  { %2485 = vmatprep.subr.mxu1 %v2702_v0  ;;  %2617 = vpow2.f32 %v2137_v31 }
 0x91a   :  { %2486 = vmatpush3.msra.mxu1 %v1539_v21 }
 0x91b   :  { %2487 = vmatprep.subr.mxu1 %v2702_v0 }
 0x91c   :  { %2488 = vmatpush3.msra.mxu1 %v2451_v48 }
 0x91d   :  { %2489 = vmatprep.subr.mxu1 %v2702_v0  ;;  %v2604_v33 = vpop.eup %2603 }
 0x91e   :  { %2490 = vmatpush3.msra.mxu1 %v1529_v50  ;;  %v1746_v39 = vadd.f32 1.0, %v2604_v33 }
 0x91f   :  { %2492 = vmatmul.mubr.msk.f32.vlgmr.msra.gmra.mxu1 %vm43_vm2, %v3267_v35  ;;  %v2606_v32 = vpop.eup %2605 }
 0x920   :  { %v1745_v3 = vadd.f32 1.0, %v2606_v32 }
 0x921   :  { %v2608_v36 = vpop.eup %2607 }
 0x922   :  { %v2610_v40 = vpop.eup %2609  ;;  %v1748_v42 = vadd.f32 1.0, %v2608_v36 }
 0x923   :  { %v2612_v2 = vpop.eup %2611  ;;  %v1744_v6 = vadd.f32 1.0, %v2610_v40 }
 0x924   :  { %2619 = vrcp.f32 %v1748_v42  ;;  %v1747_v4 = vadd.f32 1.0, %v2612_v2  ;;  %v2614_v5 = vpop.eup %2613 }
 0x925   :  { %2621 = vrcp.f32 %v1746_v39  ;;  %v2616_v7 = vpop.eup %2615  ;;  %v1743_v8 = vadd.f32 1.0, %v2614_v5 }
 0x926   :  { %2623 = vrcp.f32 %v1747_v4  ;;  %v2618_v9 = vpop.eup %2617  ;;  %v1742_v44 = vadd.f32 1.0, %v2616_v7 }
 0x927   :  { %2625 = vrcp.f32 %v1745_v3  ;;  %v1741_v10 = vadd.f32 1.0, %v2618_v9 }
 0x928   :  { %2627 = vrcp.f32 %v1744_v6 }
 0x929   :  { %2629 = vrcp.f32 %v1743_v8 }
 0x92a   :  { %2631 = vrcp.f32 %v1742_v44 }
 0x92b   :  { %2633 = vrcp.f32 %v1741_v10 }
 0x931   :  { %v2620_v22 = vpop.eup %2619 }
 0x932   :  { %v2622_v29 = vpop.eup %2621  ;;  %v1780_v34 = vmul.f32 %v2620_v22, %v3247_v28 }
 0x933   :  { %v2624_v11 = vpop.eup %2623  ;;  %v1778_v45 = vmul.f32 %v2622_v29, %v3239_v14 }
 0x934   :  { %1873 = vrot.lane.b32.xlu1 %v1780_v34, %s2705_s29  ;;  %v1779_v19 = vmul.f32 %v2624_v11, %v3249_v30  ;;  %v2626_v16 = vpop.eup %2625 }
 0x935   :  { %v2628_v46 = vpop.eup %2627  ;;  %v1777_v48 = vmul.f32 %v2626_v16, %v3241_v26 }
 0x936   :  { %1871 = vrot.lane.b32.xlu0 %v1779_v19, %s2705_s29  ;;  %v2630_v50 = vpop.eup %2629  ;;  %v1776_v28 = vmul.f32 %v2628_v46, %v3231_v24 }
 0x937   :  { %v2632_v51 = vpop.eup %2631  ;;  %v1775_v30 = vmul.f32 %v2630_v50, %v3233_v25 }
 0x938   :  { %1869 = vrot.lane.b32.xlu1 %v1778_v45, %s2705_s29  ;;  %v2634_v38 = vpop.eup %2633  ;;  %v1774_v14 = vmul.f32 %v2632_v51, %v3223_v12 }
 0x939   :  { %v1773_v52 = vmul.f32 %v2634_v38, %v3225_v23 }
 0x93a   :  { %1867 = vrot.lane.b32.xlu0 %v1777_v48, %s2705_s29 }
 0x93c   :  { %1865 = vrot.lane.b32.xlu1 %v1776_v28, %s2705_s29 }
 0x93e   :  { %1863 = vrot.lane.b32.xlu0 %v1775_v30, %s2705_s29 }
 0x940   :  { %1861 = vrot.lane.b32.xlu1 %v1774_v14, %s2705_s29 }
 0x942   :  { %1859 = vrot.lane.b32.xlu0 %v1773_v52, %s2705_s29 }
 0x9a6   :  { %v1874_v26 = vpop.permute.xlu1 %1873 }
 0x9a7   :  { %2495 = vmatpush3.msra.mxu0 %v1874_v26 }
 0x9a8   :  { %2496 = vmatprep.subr.mxu0 %v2702_v0  ;;  %v1872_v24 = vpop.permute.xlu0 %1871 }
 0x9a9   :  { %2497 = vmatpush3.msra.mxu0 %v1872_v24 }
 0x9aa   :  { %v1870_v21 = vpop.permute.xlu1 %1869  ;;  %2498 = vmatprep.subr.mxu0 %v2702_v0 }
 0x9ab   :  { %2499 = vmatpush3.msra.mxu0 %v1870_v21 }
 0x9ac   :  { %2500 = vmatprep.subr.mxu0 %v2702_v0  ;;  %v1868_v25 = vpop.permute.xlu0 %1867 }
 0x9ad   :  { %2501 = vmatpush3.msra.mxu0 %v1868_v25 }
 0x9ae   :  { %v1866_v12 = vpop.permute.xlu1 %1865  ;;  %2502 = vmatprep.subr.mxu0 %v2702_v0 }
 0x9af   :  { %2503 = vmatpush3.msra.mxu0 %v1866_v12 }
 0x9b0   :  { %2504 = vmatprep.subr.mxu0 %v2702_v0  ;;  %v1864_v23 = vpop.permute.xlu0 %1863 }
 0x9b1   :  { %2505 = vmatpush3.msra.mxu0 %v1864_v23 }
 0x9b2   :  { %v1862_v54 = vpop.permute.xlu1 %1861  ;;  %2506 = vmatprep.subr.mxu0 %v2702_v0 }
 0x9b3   :  { %2507 = vmatpush3.msra.mxu0 %v1862_v54 }
 0x9b4   :  { %2508 = vmatprep.subr.mxu0 %v2702_v0  ;;  %v1860_v37 = vpop.permute.xlu0 %1859 }
 0x9b5   :  { %2509 = vmatpush3.msra.mxu0 %v1860_v37 }
 0x9b6   :  { %2511 = vmatmul.mubr.msk.f32.vlgmr.msra.gmra.mxu0 %vm43_vm2, %v3267_v35 }
 0x9df   :  { %v1847_v53 = vpop.f32.mrf.mxu1 }
 0x9e0   :  { %v1953_v20 = vadd.f32 %v1847_v53, %v3175_v60 }
 0x9e1   :  { %v2493_v41 = vpop.f32.mrf.mxu1 }
 0x9e2   :  { %2635 = vtanh.f32 %v1953_v20  ;;  %v2147_v18 = vmul.f32 -1.442695, %v1953_v20 }
 0x9e4   :  { %2637 = vpow2.f32 %v2147_v18 }
 0x9ef   :  { %v2636_v55 = vpop.eup %2635 }
 0x9f0   :  { %1962 = vrot.lane.b32.xlu1 %v2636_v55, %s2706_s20  ;;  %s2152_s20 = sld [smem:[#allocation5 + $0x14]] }
 0x9f1   :  { %v2638_v43 = vpop.eup %2637 }
 0x9f2   :  { %v1957_v13 = vadd.f32 1.0, %v2638_v43 }
 0x9f4   :  { %2639 = vrcp.f32 %v1957_v13 }
 0xa01   :  { %v2640_v0 = vpop.eup %2639 }
 0xa62   :  { %v1963_v56 = vpop.permute.xlu1 %1962 }
 0xa63   :  { %v1965_v47 = vmul.f32 %v2640_v0, %v1963_v56 }
 0xa76   :  { %v1949_v57 = vpop.f32.mrf.mxu0 }
 0xa77   :  { %v1966_v58 = vadd.f32 %v1965_v47, %v1949_v57 }
 0xa78   :  { %v2512_v49 = vpop.f32.mrf.mxu0 }
 0xa79   :  { %2641 = vtanh.f32 %v1966_v58 }
 0xa86   :  { %v2642_v59 = vpop.eup %2641 }
 0xa87   :  { %1969 = vrot.lane.b32.xlu0 %v2642_v59, %s2705_s29  ;;  %s1981_s29 = scalar_lea.vmem [#allocation3], %s2149_s4 }
 0xaf9   :  { %v1970_v60 = vpop.permute.xlu0 %1969 }
 0xafa   :  { %v1972_v62 = vmul.f32 %v2640_v0, %v1970_v60 }
 0xafc   :  { %v1973_v61 = vsel %vm83_vm1, %v1966_v58, %v1972_v62 }
 0xafd   :  { %1978 = vst.msk [vmem:[%s1977_s14] sm:$0x1] %vm780_vm4, %v1973_v61 }
 0xafe   :  { %1975 = vst.msk [vmem:[#allocation9 + $0x10] sm:$0xff] %vm43_vm2, %v1973_v61 }
 0xaff   :  { %1982 = vst.msk [vmem:[%s1981_s29 - $0x1] sm:$0x2] %vm785_vm5, %v1973_v61 }
 0xb00   :  { %2683 = shalt.err (!%p2680_p9)
}
 0xb01   :  { %2018 = dma.vmem_to_hbm [thread:$0]  %s2013_s13, 384, %s3331_s7, [#allocation8], %s2700_s30, %s2700_s30, %s2701_s8  }
 0xb02   :  { %s1985_s18 = scalar_lea.vmem [#allocation3], %s2150_s0  ;;  %s1989_s6 = scalar_lea.vmem [#allocation3], %s2151_s9 }
 0xb03   :  { %1986 = vst.msk [vmem:[%s1985_s18 - $0x2] sm:$0x4] %vm790_vm6, %v1973_v61  ;;  %s1993_s19 = scalar_lea.vmem [#allocation3], %s2152_s20  ;;  %s1997_s21 = scalar_lea.vmem [#allocation3], %s3299_s10 }
 0xb04   :  { %1990 = vst.msk [vmem:[%s1989_s6 - $0x3] sm:$0x8] %vm795_vm7, %v1973_v61  ;;  %s2001_s22 = scalar_lea.vmem [#allocation3], %s3301_s11  ;;  %s2005_s23 = scalar_lea.vmem [#allocation3], %s3303_s1 }
 0xb05   :  { %1994 = vst.msk [vmem:[%s1993_s19 - $0x4] sm:$0x10] %vm800_vm8, %v1973_v61 }
 0xb06   :  { %1998 = vst.msk [vmem:[%s1997_s21 - $0x5] sm:$0x20] %vm805_vm9, %v1973_v61 }
 0xb07   :  { %2002 = vst.msk [vmem:[%s2001_s22 - $0x6] sm:$0x40] %vm810_vm10, %v1973_v61 }
 0xb08   :  { %2006 = vst.msk [vmem:[%s2005_s23 - $0x7] sm:$0x80] %vm815_vm11, %v1973_v61 }
 0xb09   :  { %2696 = dma.done.wait [#allocation8], 384  }
 0xb0a   :  { %2697 = vsyncadd [#allocation8], 4294966912 }
 0xb0b   :  { %2022 = vsyncpa [#allocation7], 1 }
 0xb0c   :  { %2023 = vsyncpa [#allocation8], 1 }

</bundles_post_ra>
